<compile_context>
chip_gen: v7x
topology: tpu7x:2x2x1
jax: 0.10.0
libtpu: 0.0.40
codegen_flags: <defaults>
</compile_context>

<pallas_src>
import numpy as np
import jax
import jax.numpy as jnp
from jax.experimental import pallas as pl
from jax.experimental.pallas import tpu as pltpu


def _round_up(x, m):
    return -(-x // m) * m


def _bilinear_matrix_np(n_out, n_in):
    """Dense (n_out, n_in) matrix implementing 1-D bilinear resize, align_corners=True."""
    if n_out == 1 or n_in == 1:
        src = np.zeros((n_out,), np.float64)
    else:
        src = np.arange(n_out, dtype=np.float64) * ((n_in - 1) / (n_out - 1))
    i0 = np.clip(np.floor(src).astype(np.int64), 0, n_in - 1)
    i1 = np.clip(i0 + 1, 0, n_in - 1)
    frac = (src - i0).astype(np.float32)
    m = np.zeros((n_out, n_in), np.float32)
    rows = np.arange(n_out)
    m[rows, i0] += (1.0 - frac)
    m[rows, i1] += frac
    return m


def upconv_kernel(x_ref, ah_ref, aw_ref, w_ref, b_ref, o_ref, pad_ref):
    # Per grid step (n, t):
    # x_ref  : (1, 1, band, Win*Cin)  banded input rows for this tile (channels on lanes)
    # ah_ref : (1, R, band)           H-interp rows for this tile (band-local columns,
    #                                 conv zero-pad rows baked in), R = tile_h + 2
    # aw_ref : (Wp, Win)              W-interp with zero rows at col 0 and cols >= Wout+1
    # w_ref  : (9, Cin, Cout)         conv taps, k = 3*kh + kw
    # b_ref  : (1, Cout)              bias (f32)
    # o_ref  : (1, tile_h*Wout, Cout) NHWC-flat output slab
    # pad_ref: (R*Wp + 8, Cin)        flat padded upsampled tile (VMEM scratch)
    R = ah_ref.shape[1]
    Wp, Win = aw_ref.shape
    Cin, Cout = w_ref.shape[1], w_ref.shape[2]
    tile_h = R - 2
    Wout = o_ref.shape[1] // tile_h
    cdt = x_ref.dtype

    # Zero the slack rows once per step (read only by last-row taps whose outputs are
    # discarded; keeps stale VMEM garbage / NaNs out of the MXU).
    pad_ref[pl.ds(R * Wp, 8), :] = jnp.zeros((8, Cin), pad_ref.dtype)

    # ---- bilinear upsample ----
    # H pass: one MXU dot over the banded input rows only.
    t = jnp.dot(ah_ref[0], x_ref[0, 0], preferred_element_type=jnp.float32)   # (R, Win*Cin)
    t3 = t.astype(cdt).reshape(R, Win, Cin)                                   # channels -> lanes

    # W pass: stream row-by-row straight into pad_ref (no broadcast, no materialized tile).
    for r in range(R):
        row = jnp.dot(aw_ref[...], t3[r], preferred_element_type=jnp.float32)  # (Wp, Cin)
        pad_ref[pl.ds(r * Wp, Wp), :] = row.astype(pad_ref.dtype)

    # ---- 3x3 conv + bias, chunked over output rows ----
    # Taps are sublane offsets on the flat (HW, Cin) buffer; all 9 taps accumulate in
    # registers for a chunk, padded columns are dropped and the chunk is stored once.
    ch = tile_h if tile_h <= 8 else next(d for d in (8, 4, 2, 1) if tile_h % d == 0)
    mblk = ch * Wp
    bias_b = jnp.broadcast_to(b_ref[...], (mblk, Cout))        # hoisted out of the loop
    for r0 in range(0, tile_h, ch):
        base = r0 * Wp
        acc = None
        for kh in range(3):
            for kw in range(3):
                patch = pad_ref[pl.ds(base + kh * Wp + kw, mblk), :]           # (mblk, Cin)
                d = jnp.dot(patch, w_ref[3 * kh + kw],
                            preferred_element_type=jnp.float32)               # (mblk, Cout)
                acc = (d + bias_b) if acc is None else (acc + d)
        out_blk = acc.reshape(ch, Wp, Cout)[:, :Wout, :].reshape(ch * Wout, Cout)
        o_ref[0, pl.ds(r0 * Wout, ch * Wout), :] = out_blk.astype(o_ref.dtype)


def _vmem_estimate(tile_h, band, Win, Cin, Cout, itemsize):
    """Rough per-tile VMEM bytes (double-buffered blocks + scratch + transients)."""
    R = tile_h + 2
    Wout = 2 * Win
    Wp = _round_up(Wout + 2, 8)
    x_blk = 2 * band * Win * Cin * itemsize
    ah_blk = 2 * R * band * itemsize
    aw_blk = 2 * Wp * Win * itemsize
    w_blk = 2 * 9 * Cin * Cout * itemsize
    o_blk = 2 * tile_h * Wout * Cout * 4
    pad = (R * Wp + 8) * Cin * itemsize
    trans = (R * Win * Cin * (4 + itemsize)
             + 8 * Wp * (Cout * 4 + 2 * Cin * itemsize)
             + Wp * Cin * 4)
    return x_blk + ah_blk + aw_blk + w_blk + o_blk + pad + trans


def _pick_tile_h(Hout, Wout, Hin, Win, Cin, Cout, itemsize, budget_bytes, block_h):
    cands = [d for d in range(1, Hout + 1)
             if Hout % d == 0 and (d == Hout or (d * Wout) % 8 == 0)]
    if block_h is not None and block_h in cands:
        return block_h
    cands.sort(reverse=True)
    for d in cands:
        if d > 64:
            continue
        band = min(Hin, _round_up(d // 2 + 4, 8))
        if _vmem_estimate(d, band, Win, Cin, Cout, itemsize) <= budget_bytes:
            return d
    return cands[-1]


def upconv_forward(x, weight, bias, *, block_h=None, compute_dtype=jnp.bfloat16,
                   vmem_budget_bytes=36 * 2**20):
    """x: (N, Cin, Hin, Win); weight: (Cout, Cin, 3, 3) [PyTorch OIHW]; bias: (Cout,).

    compute_dtype=bfloat16 is the performance path (f32 accumulation is kept throughout);
    pass jnp.float32 for bit-tight comparisons against the reference.
    """
    N, Cin, Hin, Win = x.shape
    Cout = weight.shape[0]
    Hout, Wout = 2 * Hin, 2 * Win                       # F.interpolate(scale_factor=2)
    itemsize = jnp.dtype(compute_dtype).itemsize

    tile_h = _pick_tile_h(Hout, Wout, Hin, Win, Cin, Cout, itemsize,
                          vmem_budget_bytes, block_h)
    n_tiles = Hout // tile_h
    R = tile_h + 2
    Wp = _round_up(Wout + 2, 8)

    # ---- interp operators built host-side (numpy) with conv zero-pad rows baked in ----
    ah = _bilinear_matrix_np(Hout, Hin)                 # (Hout, Hin)
    ah_pad = np.pad(ah, ((1, 1), (0, 0)))               # (Hout+2, Hin)
    blocks = [ah_pad[t * tile_h: t * tile_h + R] for t in range(n_tiles)]

    # input-row band each tile actually needs (columns with nonzero interp weight)
    spans = []
    for blk in blocks:
        nz = np.nonzero(np.any(blk != 0.0, axis=0))[0]
        spans.append((int(nz[0]), int(nz[-1])) if nz.size else (0, 0))
    band = min(Hin, _round_up(max(hi - lo + 1 for lo, hi in spans), 8))
    starts = [min(lo, Hin - band) for lo, _ in spans]
    ah_bands = np.stack([blk[:, s:s + band] for blk, s in zip(blocks, starts)], 0)

    aw = _bilinear_matrix_np(Wout, Win)                 # (Wout, Win)
    aw_pad = np.zeros((Wp, Win), np.float32)
    aw_pad[1:Wout + 1] = aw

    # conv taps tap-major with (Cin, Cout) per tap; bias as a lane row (kept f32)
    w_taps = jnp.transpose(weight, (2, 3, 1, 0)).reshape(9, Cin, Cout).astype(compute_dtype)
    b2 = bias.reshape(1, Cout).astype(jnp.float32)

    # channels-last input, restaged once into overlapping per-tile Hin bands:
    # (N, n_tiles, band, Win*Cin).  One extra HBM pass in the wrapper buys band-sized
    # per-tile DMA and a band-sized (instead of full-Hin) H-pass contraction in the kernel.
    x_t = jnp.transpose(x, (0, 2, 3, 1)).reshape(N, Hin, Win * Cin).astype(compute_dtype)
    x_bands = jnp.stack([x_t[:, s:s + band] for s in starts], axis=1)

    ah_j = jnp.asarray(ah_bands).astype(compute_dtype)
    aw_j = jnp.asarray(aw_pad).astype(compute_dtype)

    est = _vmem_estimate(tile_h, band, Win, Cin, Cout, itemsize)
    vmem_limit = int(min(max(int(1.5 * est), 32 * 2**20), 56 * 2**20))

    out_nhwc = pl.pallas_call(
        upconv_kernel,
        out_shape=jax.ShapeDtypeStruct((N, Hout * Wout, Cout), x.dtype),
        grid_spec=pltpu.PrefetchScalarGridSpec(
            num_scalar_prefetch=0,
            grid=(N, n_tiles),
            in_specs=[
                pl.BlockSpec((1, 1, band, Win * Cin), lambda n, t: (n, t, 0, 0)),
                pl.BlockSpec((1, R, band), lambda n, t: (t, 0, 0)),
                pl.BlockSpec((Wp, Win), lambda n, t: (0, 0)),
                pl.BlockSpec((9, Cin, Cout), lambda n, t: (0, 0, 0)),
                pl.BlockSpec((1, Cout), lambda n, t: (0, 0)),
            ],
            out_specs=pl.BlockSpec((1, tile_h * Wout, Cout), lambda n, t: (n, t, 0)),
            scratch_shapes=[
                pltpu.VMEM((R * Wp + 8, Cin), compute_dtype),   # flat padded upsampled tile
            ],
        ),
        compiler_params=pltpu.CompilerParams(
            dimension_semantics=("parallel", "parallel"),
            vmem_limit_bytes=vmem_limit),
    )(x_bands, ah_j, aw_j, w_taps, b2)

    # NHWC-flat -> NCHW: wrapper-side XLA transpose runs at HBM bandwidth.
    return out_nhwc.reshape(N, Hout, Wout, Cout).transpose(0, 3, 1, 2)


def upconv_reference(x, weight, bias):
    """Pure-JAX reference (same semantics as PyTorch UpConv.forward)."""
    N, Cin, Hin, Win = x.shape
    Hout, Wout = 2 * Hin, 2 * Win
    ah = jnp.asarray(_bilinear_matrix_np(Hout, Hin))
    aw = jnp.asarray(_bilinear_matrix_np(Wout, Win))
    up = jnp.einsum('ph,nchw->ncpw', ah, x)
    up = jnp.einsum('qw,ncpw->ncpq', aw, up)
    out = jax.lax.conv_general_dilated(
        up, weight, window_strides=(1, 1), padding=((1, 1), (1, 1)),
        dimension_numbers=('NCHW', 'OIHW', 'NCHW'))
    return out + bias[None, :, None, None]


if __name__ == "__main__":
    N, Cin, Cout, H, W = 2, 4, 8, 16, 16
    key = jax.random.PRNGKey(0)
    kx, kw, kb = jax.random.split(key, 3)

    x = jax.random.normal(kx, (N, Cin, H, W), dtype=jnp.float32)
    # Deterministic synthetic parameters (shapes from nn.Conv2d(inc, outc, 3, padding=1)).
    weight = jax.random.normal(kw, (Cout, Cin, 3, 3), dtype=jnp.float32) * 0.1
    bias = jax.random.normal(kb, (Cout,), dtype=jnp.float32) * 0.1

    ref = upconv_reference(x, weight, bias)

    # f32 compute path (tight tolerance); block_h=8 -> 4 H-tiles of 8 output rows.
    out_f32 = jax.block_until_ready(
        upconv_forward(x, weight, bias, block_h=8, compute_dtype=jnp.float32))
    assert out_f32.shape == (N, Cout, 2 * H, 2 * W), out_f32.shape
    assert jnp.allclose(out_f32, ref, rtol=1e-4, atol=1e-4), \
        float(jnp.max(jnp.abs(out_f32 - ref)))

    # Default bf16 performance path (f32 accumulation) -- relaxed tolerance.
    out_bf16 = jax.block_until_ready(upconv_forward(x, weight, bias, block_h=8))
    assert out_bf16.shape == (N, Cout, 2 * H, 2 * W), out_bf16.shape
    assert jnp.allclose(out_bf16, ref, rtol=1e-1, atol=1e-1), \
        float(jnp.max(jnp.abs(out_bf16 - ref)))

    print("KERNEL_OK")
</pallas_src>

<mosaic_0001>
module attributes {stable_mosaic.version = 11 : i64} {
  func.func @upconv_kernel(%arg0: i32, %arg1: i32, %arg2: memref<1x1x8x64xf32, #tpu.memory_space<vmem>>, %arg3: memref<1x10x8xf32, #tpu.memory_space<vmem>>, %arg4: memref<40x16xf32, #tpu.memory_space<vmem>>, %arg5: memref<9x4x8xf32, #tpu.memory_space<vmem>>, %arg6: memref<1x8xf32, #tpu.memory_space<vmem>>, %arg7: memref<1x256x8xf32, #tpu.memory_space<vmem>>, %arg8: memref<408x4xf32, #tpu.memory_space<vmem>>) attributes {dimension_semantics = [#tpu.dimension_semantics<parallel>, #tpu.dimension_semantics<parallel>], iteration_bounds = array<i64: 2, 4>, scalar_prefetch = 0 : i64, scratch_operands = 1 : i64, tpu.core_type = #tpu.core_type<tc>, window_params = [{transform_indices = @transform_0, window_bounds = array<i64: 1, 1, 8, 64>}, {transform_indices = @transform_1, window_bounds = array<i64: 1, 10, 8>}, {pipeline_mode = #tpu.pipeline_mode<synchronous>, transform_indices = @transform_2, window_bounds = array<i64: 40, 16>}, {pipeline_mode = #tpu.pipeline_mode<synchronous>, transform_indices = @transform_3, window_bounds = array<i64: 9, 4, 8>}, {pipeline_mode = #tpu.pipeline_mode<synchronous>, transform_indices = @transform_4, window_bounds = array<i64: 1, 8>}, {transform_indices = @transform_5, window_bounds = array<i64: 1, 256, 8>}]} {
    %cst = arith.constant 0.000000e+00 : f32
    %0 = vector.broadcast %cst : f32 to vector<8x4xf32>
    %c400 = arith.constant 400 : index
    %c0 = arith.constant 0 : index
    %1 = vector.load %arg8[%c400, %c0] : memref<408x4xf32, #tpu.memory_space<vmem>>, vector<8x4xf32>
    tpu.vector_store %arg8[%c400, %c0], %0 {strides = array<i32>} : memref<408x4xf32, #tpu.memory_space<vmem>>, vector<8x4xf32>,
    %c0_0 = arith.constant 0 : index
    %c0_1 = arith.constant 0 : index
    %c0_2 = arith.constant 0 : index
    %2 = vector.load %arg3[%c0_0, %c0_1, %c0_2] : memref<1x10x8xf32, #tpu.memory_space<vmem>>, vector<1x10x8xf32>
    %3 = vector.shape_cast %2 : vector<1x10x8xf32> to vector<10x8xf32>
    %c0_3 = arith.constant 0 : index
    %c0_4 = arith.constant 0 : index
    %c0_5 = arith.constant 0 : index
    %c0_6 = arith.constant 0 : index
    %4 = vector.load %arg2[%c0_3, %c0_4, %c0_5, %c0_6] : memref<1x1x8x64xf32, #tpu.memory_space<vmem>>, vector<1x1x8x64xf32>
    %5 = vector.shape_cast %4 : vector<1x1x8x64xf32> to vector<8x64xf32>
    %cst_7 = arith.constant dense<0.000000e+00> : vector<10x64xf32>
    %6 = tpu.matmul %3, %5, %cst_7 {dimension_numbers = #tpu.dot_dimension_numbers<[1], [0], [0], [1], [0, 0, 1, 1], [], []>} : vector<10x8xf32>, vector<8x64xf32>, vector<10x64xf32> -> vector<10x64xf32>
    %7 = vector.shape_cast %6 : vector<10x64xf32> to vector<10x16x4xf32>
    %c0_8 = arith.constant 0 : index
    %c0_9 = arith.constant 0 : index
    %8 = vector.load %arg4[%c0_8, %c0_9] : memref<40x16xf32, #tpu.memory_space<vmem>>, vector<40x16xf32>
    %9 = vector.extract_strided_slice %7 {offsets = [0, 0, 0], sizes = [1, 16, 4], strides = [1, 1, 1]} : vector<10x16x4xf32> to vector<1x16x4xf32>
    %10 = vector.shape_cast %9 : vector<1x16x4xf32> to vector<16x4xf32>
    %cst_10 = arith.constant dense<0.000000e+00> : vector<40x4xf32>
    %11 = tpu.matmul %8, %10, %cst_10 {dimension_numbers = #tpu.dot_dimension_numbers<[1], [0], [0], [1], [0, 0, 1, 1], [], []>} : vector<40x16xf32>, vector<16x4xf32>, vector<40x4xf32> -> vector<40x4xf32>
    %c0_11 = arith.constant 0 : index
    %c0_12 = arith.constant 0 : index
    %12 = vector.load %arg8[%c0_11, %c0_12] : memref<408x4xf32, #tpu.memory_space<vmem>>, vector<40x4xf32>
    tpu.vector_store %arg8[%c0_11, %c0_12], %11 {strides = array<i32>} : memref<408x4xf32, #tpu.memory_space<vmem>>, vector<40x4xf32>,
    %c0_13 = arith.constant 0 : index
    %c0_14 = arith.constant 0 : index
    %13 = vector.load %arg4[%c0_13, %c0_14] : memref<40x16xf32, #tpu.memory_space<vmem>>, vector<40x16xf32>
    %14 = vector.extract_strided_slice %7 {offsets = [1, 0, 0], sizes = [1, 16, 4], strides = [1, 1, 1]} : vector<10x16x4xf32> to vector<1x16x4xf32>
    %15 = vector.shape_cast %14 : vector<1x16x4xf32> to vector<16x4xf32>
    %cst_15 = arith.constant dense<0.000000e+00> : vector<40x4xf32>
    %16 = tpu.matmul %13, %15, %cst_15 {dimension_numbers = #tpu.dot_dimension_numbers<[1], [0], [0], [1], [0, 0, 1, 1], [], []>} : vector<40x16xf32>, vector<16x4xf32>, vector<40x4xf32> -> vector<40x4xf32>
    %c40 = arith.constant 40 : index
    %c0_16 = arith.constant 0 : index
    %17 = vector.load %arg8[%c40, %c0_16] : memref<408x4xf32, #tpu.memory_space<vmem>>, vector<40x4xf32>
    tpu.vector_store %arg8[%c40, %c0_16], %16 {strides = array<i32>} : memref<408x4xf32, #tpu.memory_space<vmem>>, vector<40x4xf32>,
    %c0_17 = arith.constant 0 : index
    %c0_18 = arith.constant 0 : index
    %18 = vector.load %arg4[%c0_17, %c0_18] : memref<40x16xf32, #tpu.memory_space<vmem>>, vector<40x16xf32>
    %19 = vector.extract_strided_slice %7 {offsets = [2, 0, 0], sizes = [1, 16, 4], strides = [1, 1, 1]} : vector<10x16x4xf32> to vector<1x16x4xf32>
    %20 = vector.shape_cast %19 : vector<1x16x4xf32> to vector<16x4xf32>
    %cst_19 = arith.constant dense<0.000000e+00> : vector<40x4xf32>
    %21 = tpu.matmul %18, %20, %cst_19 {dimension_numbers = #tpu.dot_dimension_numbers<[1], [0], [0], [1], [0, 0, 1, 1], [], []>} : vector<40x16xf32>, vector<16x4xf32>, vector<40x4xf32> -> vector<40x4xf32>
    %c80 = arith.constant 80 : index
    %c0_20 = arith.constant 0 : index
    %22 = vector.load %arg8[%c80, %c0_20] : memref<408x4xf32, #tpu.memory_space<vmem>>, vector<40x4xf32>
    tpu.vector_store %arg8[%c80, %c0_20], %21 {strides = array<i32>} : memref<408x4xf32, #tpu.memory_space<vmem>>, vector<40x4xf32>,
    %c0_21 = arith.constant 0 : index
    %c0_22 = arith.constant 0 : index
    %23 = vector.load %arg4[%c0_21, %c0_22] : memref<40x16xf32, #tpu.memory_space<vmem>>, vector<40x16xf32>
    %24 = vector.extract_strided_slice %7 {offsets = [3, 0, 0], sizes = [1, 16, 4], strides = [1, 1, 1]} : vector<10x16x4xf32> to vector<1x16x4xf32>
    %25 = vector.shape_cast %24 : vector<1x16x4xf32> to vector<16x4xf32>
    %cst_23 = arith.constant dense<0.000000e+00> : vector<40x4xf32>
    %26 = tpu.matmul %23, %25, %cst_23 {dimension_numbers = #tpu.dot_dimension_numbers<[1], [0], [0], [1], [0, 0, 1, 1], [], []>} : vector<40x16xf32>, vector<16x4xf32>, vector<40x4xf32> -> vector<40x4xf32>
    %c120 = arith.constant 120 : index
    %c0_24 = arith.constant 0 : index
    %27 = vector.load %arg8[%c120, %c0_24] : memref<408x4xf32, #tpu.memory_space<vmem>>, vector<40x4xf32>
    tpu.vector_store %arg8[%c120, %c0_24], %26 {strides = array<i32>} : memref<408x4xf32, #tpu.memory_space<vmem>>, vector<40x4xf32>,
    %c0_25 = arith.constant 0 : index
    %c0_26 = arith.constant 0 : index
    %28 = vector.load %arg4[%c0_25, %c0_26] : memref<40x16xf32, #tpu.memory_space<vmem>>, vector<40x16xf32>
    %29 = vector.extract_strided_slice %7 {offsets = [4, 0, 0], sizes = [1, 16, 4], strides = [1, 1, 1]} : vector<10x16x4xf32> to vector<1x16x4xf32>
    %30 = vector.shape_cast %29 : vector<1x16x4xf32> to vector<16x4xf32>
    %cst_27 = arith.constant dense<0.000000e+00> : vector<40x4xf32>
    %31 = tpu.matmul %28, %30, %cst_27 {dimension_numbers = #tpu.dot_dimension_numbers<[1], [0], [0], [1], [0, 0, 1, 1], [], []>} : vector<40x16xf32>, vector<16x4xf32>, vector<40x4xf32> -> vector<40x4xf32>
    %c160 = arith.constant 160 : index
    %c0_28 = arith.constant 0 : index
    %32 = vector.load %arg8[%c160, %c0_28] : memref<408x4xf32, #tpu.memory_space<vmem>>, vector<40x4xf32>
    tpu.vector_store %arg8[%c160, %c0_28], %31 {strides = array<i32>} : memref<408x4xf32, #tpu.memory_space<vmem>>, vector<40x4xf32>,
    %c0_29 = arith.constant 0 : index
    %c0_30 = arith.constant 0 : index
    %33 = vector.load %arg4[%c0_29, %c0_30] : memref<40x16xf32, #tpu.memory_space<vmem>>, vector<40x16xf32>
    %34 = vector.extract_strided_slice %7 {offsets = [5, 0, 0], sizes = [1, 16, 4], strides = [1, 1, 1]} : vector<10x16x4xf32> to vector<1x16x4xf32>
    %35 = vector.shape_cast %34 : vector<1x16x4xf32> to vector<16x4xf32>
    %cst_31 = arith.constant dense<0.000000e+00> : vector<40x4xf32>
    %36 = tpu.matmul %33, %35, %cst_31 {dimension_numbers = #tpu.dot_dimension_numbers<[1], [0], [0], [1], [0, 0, 1, 1], [], []>} : vector<40x16xf32>, vector<16x4xf32>, vector<40x4xf32> -> vector<40x4xf32>
    %c200 = arith.constant 200 : index
    %c0_32 = arith.constant 0 : index
    %37 = vector.load %arg8[%c200, %c0_32] : memref<408x4xf32, #tpu.memory_space<vmem>>, vector<40x4xf32>
    tpu.vector_store %arg8[%c200, %c0_32], %36 {strides = array<i32>} : memref<408x4xf32, #tpu.memory_space<vmem>>, vector<40x4xf32>,
    %c0_33 = arith.constant 0 : index
    %c0_34 = arith.constant 0 : index
    %38 = vector.load %arg4[%c0_33, %c0_34] : memref<40x16xf32, #tpu.memory_space<vmem>>, vector<40x16xf32>
    %39 = vector.extract_strided_slice %7 {offsets = [6, 0, 0], sizes = [1, 16, 4], strides = [1, 1, 1]} : vector<10x16x4xf32> to vector<1x16x4xf32>
    %40 = vector.shape_cast %39 : vector<1x16x4xf32> to vector<16x4xf32>
    %cst_35 = arith.constant dense<0.000000e+00> : vector<40x4xf32>
    %41 = tpu.matmul %38, %40, %cst_35 {dimension_numbers = #tpu.dot_dimension_numbers<[1], [0], [0], [1], [0, 0, 1, 1], [], []>} : vector<40x16xf32>, vector<16x4xf32>, vector<40x4xf32> -> vector<40x4xf32>
    %c240 = arith.constant 240 : index
    %c0_36 = arith.constant 0 : index
    %42 = vector.load %arg8[%c240, %c0_36] : memref<408x4xf32, #tpu.memory_space<vmem>>, vector<40x4xf32>
    tpu.vector_store %arg8[%c240, %c0_36], %41 {strides = array<i32>} : memref<408x4xf32, #tpu.memory_space<vmem>>, vector<40x4xf32>,
    %c0_37 = arith.constant 0 : index
    %c0_38 = arith.constant 0 : index
    %43 = vector.load %arg4[%c0_37, %c0_38] : memref<40x16xf32, #tpu.memory_space<vmem>>, vector<40x16xf32>
    %44 = vector.extract_strided_slice %7 {offsets = [7, 0, 0], sizes = [1, 16, 4], strides = [1, 1, 1]} : vector<10x16x4xf32> to vector<1x16x4xf32>
    %45 = vector.shape_cast %44 : vector<1x16x4xf32> to vector<16x4xf32>
    %cst_39 = arith.constant dense<0.000000e+00> : vector<40x4xf32>
    %46 = tpu.matmul %43, %45, %cst_39 {dimension_numbers = #tpu.dot_dimension_numbers<[1], [0], [0], [1], [0, 0, 1, 1], [], []>} : vector<40x16xf32>, vector<16x4xf32>, vector<40x4xf32> -> vector<40x4xf32>
    %c280 = arith.constant 280 : index
    %c0_40 = arith.constant 0 : index
    %47 = vector.load %arg8[%c280, %c0_40] : memref<408x4xf32, #tpu.memory_space<vmem>>, vector<40x4xf32>
    tpu.vector_store %arg8[%c280, %c0_40], %46 {strides = array<i32>} : memref<408x4xf32, #tpu.memory_space<vmem>>, vector<40x4xf32>,
    %c0_41 = arith.constant 0 : index
    %c0_42 = arith.constant 0 : index
    %48 = vector.load %arg4[%c0_41, %c0_42] : memref<40x16xf32, #tpu.memory_space<vmem>>, vector<40x16xf32>
    %49 = vector.extract_strided_slice %7 {offsets = [8, 0, 0], sizes = [1, 16, 4], strides = [1, 1, 1]} : vector<10x16x4xf32> to vector<1x16x4xf32>
    %50 = vector.shape_cast %49 : vector<1x16x4xf32> to vector<16x4xf32>
    %cst_43 = arith.constant dense<0.000000e+00> : vector<40x4xf32>
    %51 = tpu.matmul %48, %50, %cst_43 {dimension_numbers = #tpu.dot_dimension_numbers<[1], [0], [0], [1], [0, 0, 1, 1], [], []>} : vector<40x16xf32>, vector<16x4xf32>, vector<40x4xf32> -> vector<40x4xf32>
    %c320 = arith.constant 320 : index
    %c0_44 = arith.constant 0 : index
    %52 = vector.load %arg8[%c320, %c0_44] : memref<408x4xf32, #tpu.memory_space<vmem>>, vector<40x4xf32>
    tpu.vector_store %arg8[%c320, %c0_44], %51 {strides = array<i32>} : memref<408x4xf32, #tpu.memory_space<vmem>>, vector<40x4xf32>,
    %c0_45 = arith.constant 0 : index
    %c0_46 = arith.constant 0 : index
    %53 = vector.load %arg4[%c0_45, %c0_46] : memref<40x16xf32, #tpu.memory_space<vmem>>, vector<40x16xf32>
    %54 = vector.extract_strided_slice %7 {offsets = [9, 0, 0], sizes = [1, 16, 4], strides = [1, 1, 1]} : vector<10x16x4xf32> to vector<1x16x4xf32>
    %55 = vector.shape_cast %54 : vector<1x16x4xf32> to vector<16x4xf32>
    %cst_47 = arith.constant dense<0.000000e+00> : vector<40x4xf32>
    %56 = tpu.matmul %53, %55, %cst_47 {dimension_numbers = #tpu.dot_dimension_numbers<[1], [0], [0], [1], [0, 0, 1, 1], [], []>} : vector<40x16xf32>, vector<16x4xf32>, vector<40x4xf32> -> vector<40x4xf32>
    %c360 = arith.constant 360 : index
    %c0_48 = arith.constant 0 : index
    %57 = vector.load %arg8[%c360, %c0_48] : memref<408x4xf32, #tpu.memory_space<vmem>>, vector<40x4xf32>
    tpu.vector_store %arg8[%c360, %c0_48], %56 {strides = array<i32>} : memref<408x4xf32, #tpu.memory_space<vmem>>, vector<40x4xf32>,
    %c0_49 = arith.constant 0 : index
    %c0_50 = arith.constant 0 : index
    %58 = vector.load %arg6[%c0_49, %c0_50] : memref<1x8xf32, #tpu.memory_space<vmem>>, vector<1x8xf32>
    %59 = vector.shape_cast %58 : vector<1x8xf32> to vector<1x8xf32>
    %60 = vector.broadcast %59 : vector<1x8xf32> to vector<320x8xf32>
    %c0_51 = arith.constant 0 : index
    %c0_52 = arith.constant 0 : index
    %61 = vector.load %arg8[%c0_51, %c0_52] : memref<408x4xf32, #tpu.memory_space<vmem>>, vector<320x4xf32>
    %c0_53 = arith.constant 0 : index
    %c0_54 = arith.constant 0 : index
    %c0_55 = arith.constant 0 : index
    %62 = vector.load %arg5[%c0_53, %c0_54, %c0_55] : memref<9x4x8xf32, #tpu.memory_space<vmem>>, vector<1x4x8xf32>
    %63 = vector.shape_cast %62 : vector<1x4x8xf32> to vector<4x8xf32>
    %cst_56 = arith.constant dense<0.000000e+00> : vector<320x8xf32>
    %64 = tpu.matmul %61, %63, %cst_56 {dimension_numbers = #tpu.dot_dimension_numbers<[1], [0], [0], [1], [0, 0, 1, 1], [], []>} : vector<320x4xf32>, vector<4x8xf32>, vector<320x8xf32> -> vector<320x8xf32>
    %65 = arith.addf %64, %60 : vector<320x8xf32>
    %c1 = arith.constant 1 : index
    %c0_57 = arith.constant 0 : index
    %66 = vector.load %arg8[%c1, %c0_57] : memref<408x4xf32, #tpu.memory_space<vmem>>, vector<320x4xf32>
    %c1_58 = arith.constant 1 : index
    %c0_59 = arith.constant 0 : index
    %c0_60 = arith.constant 0 : index
    %67 = vector.load %arg5[%c1_58, %c0_59, %c0_60] : memref<9x4x8xf32, #tpu.memory_space<vmem>>, vector<1x4x8xf32>
    %68 = vector.shape_cast %67 : vector<1x4x8xf32> to vector<4x8xf32>
    %cst_61 = arith.constant dense<0.000000e+00> : vector<320x8xf32>
    %69 = tpu.matmul %66, %68, %cst_61 {dimension_numbers = #tpu.dot_dimension_numbers<[1], [0], [0], [1], [0, 0, 1, 1], [], []>} : vector<320x4xf32>, vector<4x8xf32>, vector<320x8xf32> -> vector<320x8xf32>
    %70 = arith.addf %65, %69 : vector<320x8xf32>
    %c2 = arith.constant 2 : index
    %c0_62 = arith.constant 0 : index
    %71 = vector.load %arg8[%c2, %c0_62] : memref<408x4xf32, #tpu.memory_space<vmem>>, vector<320x4xf32>
    %c2_63 = arith.constant 2 : index
    %c0_64 = arith.constant 0 : index
    %c0_65 = arith.constant 0 : index
    %72 = vector.load %arg5[%c2_63, %c0_64, %c0_65] : memref<9x4x8xf32, #tpu.memory_space<vmem>>, vector<1x4x8xf32>
    %73 = vector.shape_cast %72 : vector<1x4x8xf32> to vector<4x8xf32>
    %cst_66 = arith.constant dense<0.000000e+00> : vector<320x8xf32>
    %74 = tpu.matmul %71, %73, %cst_66 {dimension_numbers = #tpu.dot_dimension_numbers<[1], [0], [0], [1], [0, 0, 1, 1], [], []>} : vector<320x4xf32>, vector<4x8xf32>, vector<320x8xf32> -> vector<320x8xf32>
    %75 = arith.addf %70, %74 : vector<320x8xf32>
    %c40_67 = arith.constant 40 : index
    %c0_68 = arith.constant 0 : index
    %76 = vector.load %arg8[%c40_67, %c0_68] : memref<408x4xf32, #tpu.memory_space<vmem>>, vector<320x4xf32>
    %c3 = arith.constant 3 : index
    %c0_69 = arith.constant 0 : index
    %c0_70 = arith.constant 0 : index
    %77 = vector.load %arg5[%c3, %c0_69, %c0_70] : memref<9x4x8xf32, #tpu.memory_space<vmem>>, vector<1x4x8xf32>
    %78 = vector.shape_cast %77 : vector<1x4x8xf32> to vector<4x8xf32>
    %cst_71 = arith.constant dense<0.000000e+00> : vector<320x8xf32>
    %79 = tpu.matmul %76, %78, %cst_71 {dimension_numbers = #tpu.dot_dimension_numbers<[1], [0], [0], [1], [0, 0, 1, 1], [], []>} : vector<320x4xf32>, vector<4x8xf32>, vector<320x8xf32> -> vector<320x8xf32>
    %80 = arith.addf %75, %79 : vector<320x8xf32>
    %c41 = arith.constant 41 : index
    %c0_72 = arith.constant 0 : index
    %81 = vector.load %arg8[%c41, %c0_72] : memref<408x4xf32, #tpu.memory_space<vmem>>, vector<320x4xf32>
    %c4 = arith.constant 4 : index
    %c0_73 = arith.constant 0 : index
    %c0_74 = arith.constant 0 : index
    %82 = vector.load %arg5[%c4, %c0_73, %c0_74] : memref<9x4x8xf32, #tpu.memory_space<vmem>>, vector<1x4x8xf32>
    %83 = vector.shape_cast %82 : vector<1x4x8xf32> to vector<4x8xf32>
    %cst_75 = arith.constant dense<0.000000e+00> : vector<320x8xf32>
    %84 = tpu.matmul %81, %83, %cst_75 {dimension_numbers = #tpu.dot_dimension_numbers<[1], [0], [0], [1], [0, 0, 1, 1], [], []>} : vector<320x4xf32>, vector<4x8xf32>, vector<320x8xf32> -> vector<320x8xf32>
    %85 = arith.addf %80, %84 : vector<320x8xf32>
    %c42 = arith.constant 42 : index
    %c0_76 = arith.constant 0 : index
    %86 = vector.load %arg8[%c42, %c0_76] : memref<408x4xf32, #tpu.memory_space<vmem>>, vector<320x4xf32>
    %c5 = arith.constant 5 : index
    %c0_77 = arith.constant 0 : index
    %c0_78 = arith.constant 0 : index
    %87 = vector.load %arg5[%c5, %c0_77, %c0_78] : memref<9x4x8xf32, #tpu.memory_space<vmem>>, vector<1x4x8xf32>
    %88 = vector.shape_cast %87 : vector<1x4x8xf32> to vector<4x8xf32>
    %cst_79 = arith.constant dense<0.000000e+00> : vector<320x8xf32>
    %89 = tpu.matmul %86, %88, %cst_79 {dimension_numbers = #tpu.dot_dimension_numbers<[1], [0], [0], [1], [0, 0, 1, 1], [], []>} : vector<320x4xf32>, vector<4x8xf32>, vector<320x8xf32> -> vector<320x8xf32>
    %90 = arith.addf %85, %89 : vector<320x8xf32>
    %c80_80 = arith.constant 80 : index
    %c0_81 = arith.constant 0 : index
    %91 = vector.load %arg8[%c80_80, %c0_81] : memref<408x4xf32, #tpu.memory_space<vmem>>, vector<320x4xf32>
    %c6 = arith.constant 6 : index
    %c0_82 = arith.constant 0 : index
    %c0_83 = arith.constant 0 : index
    %92 = vector.load %arg5[%c6, %c0_82, %c0_83] : memref<9x4x8xf32, #tpu.memory_space<vmem>>, vector<1x4x8xf32>
    %93 = vector.shape_cast %92 : vector<1x4x8xf32> to vector<4x8xf32>
    %cst_84 = arith.constant dense<0.000000e+00> : vector<320x8xf32>
    %94 = tpu.matmul %91, %93, %cst_84 {dimension_numbers = #tpu.dot_dimension_numbers<[1], [0], [0], [1], [0, 0, 1, 1], [], []>} : vector<320x4xf32>, vector<4x8xf32>, vector<320x8xf32> -> vector<320x8xf32>
    %95 = arith.addf %90, %94 : vector<320x8xf32>
    %c81 = arith.constant 81 : index
    %c0_85 = arith.constant 0 : index
    %96 = vector.load %arg8[%c81, %c0_85] : memref<408x4xf32, #tpu.memory_space<vmem>>, vector<320x4xf32>
    %c7 = arith.constant 7 : index
    %c0_86 = arith.constant 0 : index
    %c0_87 = arith.constant 0 : index
    %97 = vector.load %arg5[%c7, %c0_86, %c0_87] : memref<9x4x8xf32, #tpu.memory_space<vmem>>, vector<1x4x8xf32>
    %98 = vector.shape_cast %97 : vector<1x4x8xf32> to vector<4x8xf32>
    %cst_88 = arith.constant dense<0.000000e+00> : vector<320x8xf32>
    %99 = tpu.matmul %96, %98, %cst_88 {dimension_numbers = #tpu.dot_dimension_numbers<[1], [0], [0], [1], [0, 0, 1, 1], [], []>} : vector<320x4xf32>, vector<4x8xf32>, vector<320x8xf32> -> vector<320x8xf32>
    %100 = arith.addf %95, %99 : vector<320x8xf32>
    %c82 = arith.constant 82 : index
    %c0_89 = arith.constant 0 : index
    %101 = vector.load %arg8[%c82, %c0_89] : memref<408x4xf32, #tpu.memory_space<vmem>>, vector<320x4xf32>
    %c8 = arith.constant 8 : index
    %c0_90 = arith.constant 0 : index
    %c0_91 = arith.constant 0 : index
    %102 = vector.load %arg5[%c8, %c0_90, %c0_91] : memref<9x4x8xf32, #tpu.memory_space<vmem>>, vector<1x4x8xf32>
    %103 = vector.shape_cast %102 : vector<1x4x8xf32> to vector<4x8xf32>
    %cst_92 = arith.constant dense<0.000000e+00> : vector<320x8xf32>
    %104 = tpu.matmul %101, %103, %cst_92 {dimension_numbers = #tpu.dot_dimension_numbers<[1], [0], [0], [1], [0, 0, 1, 1], [], []>} : vector<320x4xf32>, vector<4x8xf32>, vector<320x8xf32> -> vector<320x8xf32>
    %105 = arith.addf %100, %104 : vector<320x8xf32>
    %106 = vector.shape_cast %105 : vector<320x8xf32> to vector<8x40x8xf32>
    %107 = vector.extract_strided_slice %106 {offsets = [0, 0, 0], sizes = [8, 32, 8], strides = [1, 1, 1]} : vector<8x40x8xf32> to vector<8x32x8xf32>
    %108 = vector.shape_cast %107 : vector<8x32x8xf32> to vector<256x8xf32>
    %c0_93 = arith.constant 0 : index
    %c0_94 = arith.constant 0 : index
    %c0_95 = arith.constant 0 : index
    %109 = vector.load %arg7[%c0_93, %c0_94, %c0_95] : memref<1x256x8xf32, #tpu.memory_space<vmem>>, vector<1x256x8xf32>
    %110 = vector.shape_cast %109 : vector<1x256x8xf32> to vector<256x8xf32>
    %111 = vector.shape_cast %108 : vector<256x8xf32> to vector<1x256x8xf32>
    tpu.vector_store %arg7[%c0_93, %c0_94, %c0_95], %111 {strides = array<i32>} : memref<1x256x8xf32, #tpu.memory_space<vmem>>, vector<1x256x8xf32>,
    return
  }
  func.func @transform_0(%arg0: i32, %arg1: i32) -> (i32, i32, i32, i32) {
    %c0_i32 = arith.constant 0 : i32
    %c0_i32_0 = arith.constant 0 : i32
    %c0_i32_1 = arith.constant 0 : i32
    return %arg0, %arg1, %c0_i32, %c0_i32_0 : i32, i32, i32, i32
  }
  func.func @transform_1(%arg0: i32, %arg1: i32) -> (i32, i32, i32) {
    %c0_i32 = arith.constant 0 : i32
    %c0_i32_0 = arith.constant 0 : i32
    %c0_i32_1 = arith.constant 0 : i32
    return %arg1, %c0_i32, %c0_i32_0 : i32, i32, i32
  }
  func.func @transform_2(%arg0: i32, %arg1: i32) -> (i32, i32) {
    %c0_i32 = arith.constant 0 : i32
    %c0_i32_0 = arith.constant 0 : i32
    %c0_i32_1 = arith.constant 0 : i32
    return %c0_i32, %c0_i32_0 : i32, i32
  }
  func.func @transform_3(%arg0: i32, %arg1: i32) -> (i32, i32, i32) {
    %c0_i32 = arith.constant 0 : i32
    %c0_i32_0 = arith.constant 0 : i32
    %c0_i32_1 = arith.constant 0 : i32
    %c0_i32_2 = arith.constant 0 : i32
    return %c0_i32, %c0_i32_0, %c0_i32_1 : i32, i32, i32
  }
  func.func @transform_4(%arg0: i32, %arg1: i32) -> (i32, i32) {
    %c0_i32 = arith.constant 0 : i32
    %c0_i32_0 = arith.constant 0 : i32
    %c0_i32_1 = arith.constant 0 : i32
    return %c0_i32, %c0_i32_0 : i32, i32
  }
  func.func @transform_5(%arg0: i32, %arg1: i32) -> (i32, i32, i32) {
    %c0_i32 = arith.constant 0 : i32
    %c0_i32_0 = arith.constant 0 : i32
    return %arg0, %arg1, %c0_i32 : i32, i32, i32
  }
}

</mosaic_0001>

<bundles_post_ra>
// kernel: tpu_custom_call.1
= control target key start
LH: loop header
LB: loop body
LE: loop exit
PB: predicated region body
PF: predicated region fallthrough
CT: control target
= control target key end

     0   :  { %s8343_s18 = smov 0   ;;  %s8345_s19 = smov 0   ;;  %s10015_s0 = inlined_call_operand.vmem [shape: f32[2,4,8,64], index: 0, kind: input, shape index: {}]   ;;  %s10016_s1 = inlined_call_operand.vmem [shape: f32[4,10,8], index: 1, kind: input, shape index: {}]   ;;  %s10017_s2 = inlined_call_operand.vmem [shape: f32[40,16], index: 2, kind: input, shape index: {}]   ;;  %s10018_s3 = inlined_call_operand.vmem [shape: f32[9,4,8], index: 3, kind: input, shape index: {}]   ;;  %s10019_s4 = inlined_call_operand.vmem [shape: f32[1,8], index: 4, kind: input, shape index: {}]   ;;  %s10020_s5 = inlined_call_operand.vmem [shape: f32[2,1024,8], index: 5, kind: output, shape index: {}]  }
   0x1   :  { %s8347_s20 = smov 0   ;;  %s8349_s21 = smov 0  }
   0x2   :  { %s8351_s22 = smov 0  }
   0x3 LB: > { %s24_s23 = sadd.s32 1, %s8283_s20  ;;  %s27_s24 = sadd.s32 1, %s8287_s21  ;;  %s8291_s22 = sphi %s8351_s22, %s15_s22   ;;  %s8287_s21 = sphi %s8349_s21, %s10192_s21   ;;  %s8283_s20 = sphi %s8347_s20, %s10191_s20   ;;  %s8279_s19 = sphi %s8345_s19, %s10190_s19   ;;  %s8275_s18 = sphi %s8343_s18, %s10189_s18  }
   0x4   : > { %p25_p0 = scmp.ge.s32.totalorder %s24_s23, 4  ;;  %p6180_p1 = scmp.ge.s32.totalorder %s8291_s22, 1 }
   0x5   : > { %p216_p2 = scmp.lt.s32.totalorder %s8291_s22, 9 }
   0x6   : > { %s10194_s23 = smov (%p25_p0, %s24_s23), 0  ;;  %s10196_s24 = smov (!%p25_p0, %s27_s24), %s8287_s21 }
   0x7   : > { %p217_p3 = pnand %p6180_p1, %p216_p2  ;;  %p29_p4 = scmp.ge.s32.totalorder %s10196_s24, 2 }
   0x9   : > { %s10198_s24 = smov (%p29_p4, %s10196_s24), 0  ;;  %220 = sbr.rel (%p217_p3) target bundleno = 1252 (0x4e4), region = 40 }
  0x10   : > { %p256_p5 = scmp.lt.s32.totalorder %s8279_s19, 1  ;;  %p258_p6 = scmp.lt.s32.totalorder %s8275_s18, 3  ;;  %vm284_vm0 = vcmask 64512   ;;  %v8307_v5 = vmov 0.0|0.0   ;;  %vm8309_vm1 = vmmov 0   ;;  %v8310_v6 = vmov 0.0  }
  0x11   : > { %s8293_s11 = smov 116   ;;  %s8294_s12 = smov 124   ;;  %7816 = vmatprep.subr.bf16.mxu1 %v8307_v5  ;;  %7072 = vmatprep.mubr.msk.f32.mxu1 %vm8309_vm1, %v8310_v6  ;;  %vm279_vm2 = vcmask 31744   ;;  %v8311_v15 = vmov 1983009808   ;;  %v463_v17 = vlaneseq  ;;  %vm835_vm3 = vcmask 130048  }
  0x12   : > { %s10200_s19 = smov (!%p256_p5, %s8279_s19), 1  ;;  %s8295_s13 = smov 112   ;;  %280 = vst.msk [vmem:[#allocation2 + $0x190] sm:$0xff] %vm279_vm2, %v8310_v6  ;;  %v461_v16 = vunpack.c.l.s4 %v8311_v15  ;;  %v8312_v26 = vmov 1934713408   ;;  %vm2149_vm4 = vcmask 1043456  }
  0x13   : > { %s259_s25 = scalar_select %p258_p6, %s8275_s18, 3  ;;  %v464_v21 = vshrl.u32 %v463_v17, 7  ;;  %v525_v27 = vunpack.c.l.s4 %v8312_v26 }
  0x14   : > { %s6181_s26 = sshll.u32 %s10200_s19, 2  ;;  %s8296_s14 = smov 120   ;;  %v462_v20 = vunpack.c.0.s8 %v461_v16 }
  0x15   : > { %s261_s27 = sadd.s32 %s6181_s26, %s259_s25  ;;  %s6620_s29 = sshll.u32 %s259_s25, 4  ;;  %v526_v36 = vunpack.c.0.s8 %v525_v27 }
  0x16   : > { %s6182_s28 = sshll.u32 %s261_s27, 3  ;;  %s268_s10 = scalar_lea.vmem %s10016_s1, %s6620_s29  ;;  %v8470_v25 = vsub.s32 %v462_v20, %v464_v21 }
  0x17   : > { %s263_s7 = scalar_lea.vmem %s10015_s0, %s6182_s28  ;;  %v281_v1 = vld [vmem:[%s268_s10] sm:$0xff]  ;;  %v282_v2 = vld [vmem:[%s268_s10 + $0x8] sm:$0x3]  ;;  %s8297_s15 = smov 104   ;;  %v8498_v47 = vsub.s32 %v526_v36, %v464_v21 }
  0x18   : > { %v283_v0 = vld [vmem:[%s263_s7] sm:$0xff]  ;;  %7065 = vmatprep.mubr.msk.f32.mxu0 %vm284_vm0, %v281_v1  ;;  %s8298_s16 = smov 108   ;;  %s8299_s17 = smov 96  }
  0x19   : > { %7063 = vmatprep.subr.mxu0 %v283_v0  ;;  %s8300_s25 = smov 100   ;;  %s8301_s26 = smov 88  }
  0x1a   : > { %7064 = vmatpush3.msra.mxu0 %v283_v0  ;;  %s8302_s27 = smov 92   ;;  %s8303_s28 = smov 80  }
  0x1b   : > { %7066 = vmatmul.mubr.msk.f32.vlgmr.msra.gmra.mrb[0].mxu0 %vm284_vm0, %v282_v2  ;;  %s8304_s29 = smov 84   ;;  %s8305_s30 = smov 72   ;;  %7819 = vmatprep.subr.bf16.mxu0 %v8307_v5 }
  0x1c   : > { %s8306_s6 = smov 76   ;;  %s8308_s7 = smov 68   ;;  %7091 = vmatprep.mubr.msk.f32.mxu0 %vm8309_vm1, %v8310_v6 }
  0xee   : > { %v8388_v3 = vpop.f32.mrb[0].mxu0 }
  0xef   : > { %v8390_v4 = vpop.f32.mrb[1].mxu0 }
  0xf0   : > { %380 = vrot.lane.b32.xlu1 %v8390_v4, %s8293_s11  ;;  %368 = vrot.lane.b32.xlu0 %v8390_v4, %s8294_s12 }
  0xf4   : > { %386 = vrot.lane.b32.xlu1 %v8390_v4, %s8295_s13  ;;  %374 = vrot.lane.b32.xlu0 %v8390_v4, %s8296_s14 }
  0xf8   : > { %398 = vrot.lane.b32.xlu1 %v8390_v4, %s8297_s15  ;;  %392 = vrot.lane.b32.xlu0 %v8390_v4, %s8298_s16 }
  0xfc   : > { %410 = vrot.lane.b32.xlu1 %v8390_v4, %s8299_s17  ;;  %404 = vrot.lane.b32.xlu0 %v8390_v4, %s8300_s25 }
 0x100   : > { %422 = vrot.lane.b32.xlu1 %v8390_v4, %s8301_s26  ;;  %416 = vrot.lane.b32.xlu0 %v8390_v4, %s8302_s27 }
 0x104   : > { %434 = vrot.lane.b32.xlu1 %v8390_v4, %s8303_s28  ;;  %428 = vrot.lane.b32.xlu0 %v8390_v4, %s8304_s29 }
 0x108   : > { %446 = vrot.lane.b32.xlu1 %v8390_v4, %s8305_s30  ;;  %440 = vrot.lane.b32.xlu0 %v8390_v4, %s8306_s6 }
 0x10c   : > { %370 = vrot.lane.b32.xlu1 %v8388_v3, %s8294_s12  ;;  %452 = vrot.lane.b32.xlu0 %v8390_v4, %s8308_s7 }
 0x110   : > { %382 = vrot.lane.b32.xlu1 %v8388_v3, %s8293_s11  ;;  %376 = vrot.lane.b32.xlu0 %v8388_v3, %s8296_s14 }
 0x114   : > { %394 = vrot.lane.b32.xlu1 %v8388_v3, %s8298_s16  ;;  %388 = vrot.lane.b32.xlu0 %v8388_v3, %s8295_s13 }
 0x118   : > { %406 = vrot.lane.b32.xlu1 %v8388_v3, %s8300_s25  ;;  %400 = vrot.lane.b32.xlu0 %v8388_v3, %s8297_s15 }
 0x11c   : > { %418 = vrot.lane.b32.xlu1 %v8388_v3, %s8302_s27  ;;  %412 = vrot.lane.b32.xlu0 %v8388_v3, %s8299_s17  ;;  %s6185_s27 = sshll.u32 %s8275_s18, 5 }
 0x11d   : > { %p272_p7 = scmp.lt.s32.totalorder %s6185_s27, 127 }
 0x11f   : > { %s10202_s27 = smov (!%p272_p7, %s6185_s27), 127 }
 0x120   : > { %430 = vrot.lane.b32.xlu1 %v8388_v3, %s8304_s29  ;;  %424 = vrot.lane.b32.xlu0 %v8388_v3, %s8301_s26 }
 0x124   : > { %442 = vrot.lane.b32.xlu1 %v8388_v3, %s8306_s6  ;;  %436 = vrot.lane.b32.xlu0 %v8388_v3, %s8303_s28  ;;  %s6186_s28 = sshll.u32 %s10200_s19, 7 }
 0x125   : > { %s275_s29 = sadd.s32 %s6186_s28, %s10202_s27 }
 0x128   : > { %454 = vrot.lane.b32.xlu1 %v8388_v3, %s8308_s7  ;;  %448 = vrot.lane.b32.xlu0 %v8388_v3, %s8305_s30  ;;  %s6187_s30 = sshll.u32 %s275_s29, 3 }
 0x129   : > { %s9886_s9 = scalar_lea.vmem %s10020_s5, %s6187_s30 }
 0x162   : > { %v8442_v7 = vpop.permute.xlu1 %380  ;;  %v8444_v8 = vpop.permute.xlu0 %368 }
 0x163   : > { %v474_v31 = vcombine.low %v8444_v8, %v8442_v7 }
 0x165   : > { %v482_v41 = vrot.slane %v474_v31, %v8470_v25 }
 0x166   : > { %v8446_v9 = vpop.permute.xlu1 %386  ;;  %v8448_v10 = vpop.permute.xlu0 %374 }
 0x167   : > { %v458_v28 = vcombine.low %v8390_v4, %v8448_v10 }
 0x169   : > { %v466_v37 = vrot.slane %v458_v28, %v8470_v25 }
 0x16a   : > { %v8450_v11 = vpop.permute.xlu1 %398  ;;  %v8452_v12 = vpop.permute.xlu0 %392 }
 0x16b   : > { %v490_v29 = vcombine.low %v8446_v9, %v8450_v11  ;;  %v522_v48 = vcombine.low %v466_v37, %v482_v41  ;;  %v523_v59 = vcombine.high %v466_v37, %v482_v41 }
 0x16d   : > { %v498_v38 = vrot.slane %v490_v29, %v8470_v25  ;;  %v530_v62 = vrot.slane %v522_v48, %v8498_v47  ;;  %v537_v28 = vrot.slane %v523_v59, %v8498_v47 }
 0x16e   : > { %v8454_v13 = vpop.permute.xlu1 %410  ;;  %v8456_v14 = vpop.permute.xlu0 %404 }
 0x16f   : > { %v506_v22 = vcombine.low %v8452_v12, %v8456_v14 }
 0x171   : > { %v514_v32 = vrot.slane %v506_v22, %v8470_v25 }
 0x172   : > { %v8460_v18 = vpop.permute.xlu1 %422  ;;  %v8462_v19 = vpop.permute.xlu0 %416 }
 0x173   : > { %v594_v35 = vcombine.low %v8454_v13, %v8460_v18  ;;  %v554_v42 = vcombine.low %v498_v38, %v514_v32  ;;  %v555_v52 = vcombine.high %v498_v38, %v514_v32 }
 0x175   : > { %v602_v45 = vrot.slane %v594_v35, %v8470_v25  ;;  %v562_v55 = vrot.slane %v554_v42, %v8498_v47  ;;  %v569_v2 = vrot.slane %v555_v52, %v8498_v47  ;;  %v8519_v42 = vld [vmem:[%s10017_s2] sm:$0xff] }
 0x176   : > { %v8466_v23 = vpop.permute.xlu1 %434  ;;  %v8468_v24 = vpop.permute.xlu0 %428 }
 0x177   : > { %v610_v30 = vcombine.low %v8462_v19, %v8468_v24  ;;  %v586_v21 = vcombine.low %v530_v62, %v562_v55  ;;  %v611_v52 = vcombine.high %v8462_v19, %v8468_v24  ;;  %v459_v19 = vcombine.high %v8390_v4, %v8448_v10 }
 0x178   : > { %v595_v24 = vcombine.high %v8454_v13, %v8460_v18 }
 0x179   : > { %v618_v39 = vrot.slane %v610_v30, %v8470_v25 }
 0x17a   : > { %v8481_v33 = vpop.permute.xlu1 %446  ;;  %v8483_v34 = vpop.permute.xlu0 %440 }
 0x17b   : > { %v626_v40 = vcombine.low %v8466_v23, %v8481_v33  ;;  %v658_v49 = vcombine.low %v602_v45, %v618_v39  ;;  %v659_v56 = vcombine.high %v602_v45, %v618_v39  ;;  %v588_v39 = vcombine.low %v537_v28, %v569_v2 }
 0x17d   : > { %v634_v50 = vrot.slane %v626_v40, %v8470_v25  ;;  %v666_v0 = vrot.slane %v658_v49, %v8498_v47  ;;  %v673_v22 = vrot.slane %v659_v56, %v8498_v47 }
 0x17e   : > { %v371_v43 = vpop.permute.xlu1 %370  ;;  %v8493_v44 = vpop.permute.xlu0 %452 }
 0x17f   : > { %v642_v46 = vcombine.low %v8483_v34, %v8493_v44  ;;  %v643_v45 = vcombine.high %v8483_v34, %v8493_v44 }
 0x181   : > { %v650_v51 = vrot.slane %v642_v46, %v8470_v25 }
 0x182   : > { %v383_v53 = vpop.permute.xlu1 %382  ;;  %v377_v54 = vpop.permute.xlu0 %376 }
 0x183   : > { %v690_v57 = vcombine.low %v634_v50, %v650_v51  ;;  %v691_v58 = vcombine.high %v634_v50, %v650_v51  ;;  %v738_v60 = vcombine.low %v371_v43, %v383_v53  ;;  %v730_v61 = vcombine.low %v8388_v3, %v377_v54 }
 0x184   : > { %v587_v3 = vcombine.high %v530_v62, %v562_v55  ;;  %v589_v43 = vcombine.high %v537_v28, %v569_v2  ;;  %v507_v51 = vcombine.high %v8452_v12, %v8456_v14  ;;  %v627_v53 = vcombine.high %v8466_v23, %v8481_v33  ;;  %v8540_v12 = vld [vmem:[%s10017_s2 + $0x8] sm:$0xff] }
 0x185   : > { %v705_v63 = vrot.slane %v691_v58, %v8498_v47  ;;  %v698_v1 = vrot.slane %v690_v57, %v8498_v47  ;;  %v745_v15 = vrot.slane %v738_v60, %v8470_v25  ;;  %v737_v16 = vrot.slane %v730_v61, %v8470_v25  ;;  %v8584_v57 = vld [vmem:[%s10017_s2 + $0x10] sm:$0xff] }
 0x186   : > { %v395_v17 = vpop.permute.xlu1 %394  ;;  %v389_v20 = vpop.permute.xlu0 %388  ;;  %v475_v14 = vcombine.high %v8444_v8, %v8442_v7  ;;  %v491_v23 = vcombine.high %v8446_v9, %v8450_v11  ;;  %v8555_v33 = vrot.slane %v643_v45, %v8470_v25  ;;  %v8563_v4 = vrot.slane %v507_v51, %v8470_v25 }
 0x187   : > { %v722_v26 = vcombine.low %v666_v0, %v698_v1  ;;  %v723_v27 = vcombine.high %v666_v0, %v698_v1  ;;  %v762_v29 = vcombine.low %v737_v16, %v745_v15  ;;  %v724_v32 = vcombine.low %v673_v22, %v705_v63 }
 0x188   : > { %v725_v35 = vcombine.high %v673_v22, %v705_v63  ;;  %v8566_v8 = vrot.slane %v611_v52, %v8470_v25  ;;  %v8569_v9 = vrot.slane %v627_v53, %v8470_v25  ;;  %v8587_v58 = vrot.slane %v459_v19, %v8470_v25 }
 0x189   : > { %v7817_v30 = vpack.c.bf16 %v722_v26, %v586_v21  ;;  %v7820_v31 = vpack.c.bf16 %v723_v27, %v587_v3  ;;  %v8514_v36 = vrot.slane %v762_v29, %v8498_v47  ;;  %v7823_v49 = vpack.c.bf16 %v724_v32, %v588_v39  ;;  %v8638_v32 = vld [vmem:[%s10017_s2 + $0x20] sm:$0xff] }
 0x18a   : > { %v407_v37 = vpop.permute.xlu1 %406  ;;  %v401_v38 = vpop.permute.xlu0 %400  ;;  %v7826_v50 = vpack.c.bf16 %v725_v35, %v589_v43  ;;  %v8590_v59 = vrot.slane %v491_v23, %v8470_v25  ;;  %v8595_v60 = vrot.slane %v595_v24, %v8470_v25  ;;  %v706_v61 = vcombine.low %v8569_v9, %v8555_v33 }
 0x18b   : > { %v754_v40 = vcombine.low %v395_v17, %v407_v37  ;;  %v746_v41 = vcombine.low %v389_v20, %v401_v38  ;;  %7818 = vmatpush3.bf16.msra.mxu1 %v7817_v30  ;;  %7821 = vmatpush3.bf16.msra.mxu0 %v7820_v31  ;;  %v8602_v0 = vrot.slane %v475_v14, %v8470_v25  ;;  %v8619_v20 = vld [vmem:[%s10017_s2 + $0x18] sm:$0xff] }
 0x18c   : > { %7822 = vmatprep.subr.bf16.mxu1 %v8307_v5  ;;  %7825 = vmatprep.subr.bf16.mxu0 %v8307_v5  ;;  %v570_v1 = vcombine.low %v8590_v59, %v8563_v4  ;;  %v674_v16 = vcombine.low %v8595_v60, %v8566_v8  ;;  %v714_v22 = vrot.slane %v706_v61, %v8498_v47 }
 0x18d   : > { %v761_v46 = vrot.slane %v754_v40, %v8470_v25  ;;  %v753_v48 = vrot.slane %v746_v41, %v8470_v25  ;;  %v538_v21 = vcombine.low %v8587_v58, %v8602_v0  ;;  %v707_v53 = vcombine.high %v8569_v9, %v8555_v33 }
 0x18e   : > { %v419_v34 = vpop.permute.xlu1 %418  ;;  %7073 = vmatmul.mubr.msk.f32.vlgmr.msra.gmra.mrb[0].mxu1 %vm835_vm3, %v8519_v42  ;;  %7092 = vmatmul.mubr.msk.f32.vlgmr.msra.gmra.mrb[2].mxu0 %vm835_vm3, %v8519_v42  ;;  %v413_v44 = vpop.permute.xlu0 %412  ;;  %v578_v26 = vrot.slane %v570_v1, %v8498_v47  ;;  %v682_v29 = vrot.slane %v674_v16, %v8498_v47 }
 0x18f   : > { %v770_v54 = vcombine.low %v753_v48, %v761_v46  ;;  %7824 = vmatpush3.bf16.msra.mxu1 %v7823_v49  ;;  %7827 = vmatpush3.bf16.msra.mxu0 %v7826_v50  ;;  %v546_v35 = vrot.slane %v538_v21, %v8498_v47 }
 0x190   : > { %7075 = vmatprep.mubr.msk.f32.mxu1 %vm8309_vm1, %v8310_v6  ;;  %7094 = vmatprep.mubr.msk.f32.mxu0 %vm8309_vm1, %v8310_v6  ;;  %v726_v39 = vcombine.low %v682_v29, %v714_v22  ;;  %v727_v40 = vcombine.high %v682_v29, %v714_v22 }
 0x191   : > { %v8558_v7 = vrot.slane %v770_v54, %v8498_v47  ;;  %7828 = vmatprep.subr.bf16.mxu1 %v8307_v5  ;;  %7831 = vmatprep.subr.bf16.mxu0 %v8307_v5  ;;  %v590_v43 = vcombine.low %v546_v35, %v578_v26  ;;  %v591_v45 = vcombine.high %v546_v35, %v578_v26 }
 0x192   : > { %v431_v10 = vpop.permute.xlu1 %430  ;;  %7076 = vmatmul.mubr.msk.f32.gmra.mrb[2].mxu1 %vm835_vm3, %v8540_v12  ;;  %7095 = vmatmul.mubr.msk.f32.gmra.mrb[4].mxu0 %vm835_vm3, %v8540_v12  ;;  %v425_v11 = vpop.permute.xlu0 %424  ;;  %v721_v54 = vrot.slane %v707_v53, %v8498_v47 }
 0x193   : > { %v778_v13 = vcombine.low %v8514_v36, %v8558_v7  ;;  %v779_v18 = vcombine.high %v8514_v36, %v8558_v7  ;;  %v788_v55 = vcombine.low %v419_v34, %v431_v10  ;;  %v780_v56 = vcombine.low %v413_v44, %v425_v11  ;;  %7078 = vmatprep.mubr.msk.f32.mxu1 %vm8309_vm1, %v8310_v6 }
 0x194   : > { %7097 = vmatprep.mubr.msk.f32.mxu0 %vm8309_vm1, %v8310_v6  ;;  %v7832_v48 = vpack.c.bf16 %v727_v40, %v591_v45  ;;  %v571_v36 = vcombine.high %v8590_v59, %v8563_v4  ;;  %v675_v34 = vcombine.high %v8595_v60, %v8566_v8  ;;  %v539_v44 = vcombine.high %v8587_v58, %v8602_v0 }
 0x195   : > { %v795_v62 = vrot.slane %v788_v55, %v8470_v25  ;;  %v787_v63 = vrot.slane %v780_v56, %v8470_v25 }
 0x196   : > { %v443_v2 = vpop.permute.xlu1 %442  ;;  %7079 = vmatmul.mubr.msk.f32.gmra.mrb[4].mxu1 %vm835_vm3, %v8584_v57  ;;  %7098 = vmatmul.mubr.msk.f32.gmra.mrb[6].mxu0 %vm835_vm3, %v8584_v57  ;;  %v437_v15 = vpop.permute.xlu0 %436  ;;  %v585_v14 = vrot.slane %v571_v36, %v8498_v47  ;;  %v689_v19 = vrot.slane %v675_v34, %v8498_v47  ;;  %v553_v23 = vrot.slane %v539_v44, %v8498_v47 }
 0x197   : > { %v812_v17 = vcombine.low %v787_v63, %v795_v62  ;;  %7081 = vmatprep.mubr.msk.f32.mxu1 %vm8309_vm1, %v8310_v6  ;;  %7100 = vmatprep.mubr.msk.f32.mxu0 %vm8309_vm1, %v8310_v6 }
 0x198   : > { %v728_v24 = vcombine.low %v689_v19, %v721_v54  ;;  %v729_v33 = vcombine.high %v689_v19, %v721_v54  ;;  %v592_v7 = vcombine.low %v553_v23, %v585_v14  ;;  %v593_v4 = vcombine.high %v553_v23, %v585_v14 }
 0x199   : > { %v819_v3 = vrot.slane %v812_v17, %v8498_v47 }
 0x19a   : > { %v455_v27 = vpop.permute.xlu1 %454  ;;  %7082 = vmatmul.mubr.msk.f32.gmra.mrb[6].mxu1 %vm835_vm3, %v8619_v20  ;;  %7101 = vmatmul.mubr.msk.f32.gmra.mrb[8].mxu0 %vm835_vm3, %v8619_v20  ;;  %v449_v28 = vpop.permute.xlu0 %448  ;;  %v7835_v8 = vpack.c.bf16 %v728_v24, %v592_v7  ;;  %v7838_v9 = vpack.c.bf16 %v729_v33, %v593_v4 }
 0x19b   : > { %v804_v30 = vcombine.low %v443_v2, %v455_v27  ;;  %v796_v31 = vcombine.low %v437_v15, %v449_v28  ;;  %7084 = vmatprep.mubr.msk.f32.mxu1 %vm8309_vm1, %v8310_v6  ;;  %7103 = vmatprep.mubr.msk.f32.mxu0 %vm8309_vm1, %v8310_v6 }
 0x19d   : > { %v811_v37 = vrot.slane %v804_v30, %v8470_v25  ;;  %v803_v38 = vrot.slane %v796_v31, %v8470_v25  ;;  %v7829_v25 = vpack.c.bf16 %v726_v39, %v590_v43  ;;  %v8875_v30 = vld [vmem:[%s10018_s3 + $0x8] sm:$0xf] }
 0x19e   : > { %7085 = vmatmul.mubr.msk.f32.gmra.mrb[8].mxu1 %vm835_vm3, %v8638_v32  ;;  %7104 = vmatmul.mubr.msk.f32.gmra.mrb[10].mxu0 %vm835_vm3, %v8638_v32 }
 0x19f   : > { %v820_v41 = vcombine.low %v803_v38, %v811_v37  ;;  %7110 = vmatprep.mubr.msk.f32.mxu1 %vm8309_vm1, %v8310_v6  ;;  %7129 = vmatprep.mubr.msk.f32.mxu0 %vm8309_vm1, %v8310_v6 }
 0x1a1   : > { %v827_v46 = vrot.slane %v820_v41, %v8498_v47  ;;  %v8838_v47 = vld [vmem:[%s10018_s3 + $0x10] sm:$0xf] }
 0x1a2   : > { %7111 = vmatmul.mubr.msk.f32.vlgmr.msra.gmra.mrb[10].mxu1 %vm835_vm3, %v8519_v42  ;;  %7130 = vmatmul.mubr.msk.f32.vlgmr.msra.gmra.mrb[12].mxu0 %vm835_vm3, %v8519_v42 }
 0x1a3   : > { %v828_v49 = vcombine.low %v819_v3, %v827_v46  ;;  %v829_v50 = vcombine.high %v819_v3, %v827_v46  ;;  %7830 = vmatpush3.bf16.msra.mxu1 %v7829_v25  ;;  %7833 = vmatpush3.bf16.msra.mxu0 %v7832_v48 }
 0x1a4   : > { %7113 = vmatprep.mubr.msk.f32.mxu1 %vm8309_vm1, %v8310_v6  ;;  %7132 = vmatprep.mubr.msk.f32.mxu0 %vm8309_vm1, %v8310_v6 }
 0x1a5   : > { %7834 = vmatprep.subr.bf16.mxu1 %v8307_v5  ;;  %7837 = vmatprep.subr.bf16.mxu0 %v8307_v5  ;;  %v7841_v51 = vpack.c.bf16 %v828_v49, %v778_v13  ;;  %v7844_v52 = vpack.c.bf16 %v829_v50, %v779_v18 }
 0x1a6   : > { %7114 = vmatmul.mubr.msk.f32.gmra.mrb[12].mxu1 %vm835_vm3, %v8540_v12  ;;  %7133 = vmatmul.mubr.msk.f32.gmra.mrb[14].mxu0 %vm835_vm3, %v8540_v12 }
 0x1a7   : > { %7116 = vmatprep.mubr.msk.f32.mxu1 %vm8309_vm1, %v8310_v6  ;;  %7135 = vmatprep.mubr.msk.f32.mxu0 %vm8309_vm1, %v8310_v6 }
 0x1aa   : > { %7117 = vmatmul.mubr.msk.f32.gmra.mrb[14].mxu1 %vm835_vm3, %v8584_v57  ;;  %7136 = vmatmul.mubr.msk.f32.gmra.mrb[16].mxu0 %vm835_vm3, %v8584_v57 }
 0x1ab   : > { %7119 = vmatprep.mubr.msk.f32.mxu1 %vm8309_vm1, %v8310_v6  ;;  %7138 = vmatprep.mubr.msk.f32.mxu0 %vm8309_vm1, %v8310_v6 }
 0x1ae   : > { %7120 = vmatmul.mubr.msk.f32.gmra.mrb[16].mxu1 %vm835_vm3, %v8619_v20  ;;  %7139 = vmatmul.mubr.msk.f32.gmra.mrb[18].mxu0 %vm835_vm3, %v8619_v20 }
 0x1af   : > { %7122 = vmatprep.mubr.msk.f32.mxu1 %vm8309_vm1, %v8310_v6  ;;  %7141 = vmatprep.mubr.msk.f32.mxu0 %vm8309_vm1, %v8310_v6 }
 0x1b2   : > { %7123 = vmatmul.mubr.msk.f32.gmra.mrb[18].mxu1 %vm835_vm3, %v8638_v32  ;;  %7142 = vmatmul.mubr.msk.f32.gmra.mrb[20].mxu0 %vm835_vm3, %v8638_v32 }
 0x1b3   : > { %7148 = vmatprep.mubr.msk.f32.mxu1 %vm8309_vm1, %v8310_v6  ;;  %7167 = vmatprep.mubr.msk.f32.mxu0 %vm8309_vm1, %v8310_v6 }
 0x1b6   : > { %7149 = vmatmul.mubr.msk.f32.vlgmr.msra.gmra.mrb[20].mxu1 %vm835_vm3, %v8519_v42  ;;  %7168 = vmatmul.mubr.msk.f32.vlgmr.msra.gmra.mrb[22].mxu0 %vm835_vm3, %v8519_v42 }
 0x1b7   : > { %7836 = vmatpush3.bf16.msra.mxu1 %v7835_v8  ;;  %7839 = vmatpush3.bf16.msra.mxu0 %v7838_v9 }
 0x1b8   : > { %7151 = vmatprep.mubr.msk.f32.mxu1 %vm8309_vm1, %v8310_v6  ;;  %7170 = vmatprep.mubr.msk.f32.mxu0 %vm8309_vm1, %v8310_v6 }
 0x1b9   : > { %7840 = vmatprep.subr.bf16.mxu1 %v8307_v5  ;;  %7843 = vmatprep.subr.bf16.mxu0 %v8307_v5  ;;  %v2028_v5 = vld [vmem:[%s10018_s3] sm:$0xf] }
 0x1ba   : > { %7152 = vmatmul.mubr.msk.f32.gmra.mrb[22].mxu1 %vm835_vm3, %v8540_v12  ;;  %7171 = vmatmul.mubr.msk.f32.gmra.mrb[24].mxu0 %vm835_vm3, %v8540_v12 }
 0x1bb   : > { %7154 = vmatprep.mubr.msk.f32.mxu1 %vm8309_vm1, %v8310_v6  ;;  %7173 = vmatprep.mubr.msk.f32.mxu0 %vm8309_vm1, %v8310_v6 }
 0x1be   : > { %7155 = vmatmul.mubr.msk.f32.gmra.mrb[24].mxu1 %vm835_vm3, %v8584_v57  ;;  %7174 = vmatmul.mubr.msk.f32.gmra.mrb[26].mxu0 %vm835_vm3, %v8584_v57 }
 0x1bf   : > { %7157 = vmatprep.mubr.msk.f32.mxu1 %vm8309_vm1, %v8310_v6  ;;  %7176 = vmatprep.mubr.msk.f32.mxu0 %vm8309_vm1, %v8310_v6 }
 0x1c2   : > { %7158 = vmatmul.mubr.msk.f32.gmra.mrb[26].mxu1 %vm835_vm3, %v8619_v20  ;;  %7177 = vmatmul.mubr.msk.f32.gmra.mrb[28].mxu0 %vm835_vm3, %v8619_v20 }
 0x1c3   : > { %7160 = vmatprep.mubr.msk.f32.mxu1 %vm8309_vm1, %v8310_v6  ;;  %7179 = vmatprep.mubr.msk.f32.mxu0 %vm8309_vm1, %v8310_v6 }
 0x1c6   : > { %7161 = vmatmul.mubr.msk.f32.gmra.mrb[28].mxu1 %vm835_vm3, %v8638_v32  ;;  %7180 = vmatmul.mubr.msk.f32.gmra.mrb[30].mxu0 %vm835_vm3, %v8638_v32 }
 0x1c7   : > { %7186 = vmatprep.mubr.msk.f32.mxu1 %vm8309_vm1, %v8310_v6  ;;  %7205 = vmatprep.mubr.msk.f32.mxu0 %vm8309_vm1, %v8310_v6 }
 0x1ca   : > { %7187 = vmatmul.mubr.msk.f32.vlgmr.msra.gmra.mrb[30].mxu1 %vm835_vm3, %v8519_v42  ;;  %7206 = vmatmul.mubr.msk.f32.vlgmr.msra.gmra.mrb[32].mxu0 %vm835_vm3, %v8519_v42 }
 0x1cb   : > { %7842 = vmatpush3.bf16.msra.mxu1 %v7841_v51  ;;  %7845 = vmatpush3.bf16.msra.mxu0 %v7844_v52 }
 0x1cc   : > { %7189 = vmatprep.mubr.msk.f32.mxu1 %vm8309_vm1, %v8310_v6  ;;  %7208 = vmatprep.mubr.msk.f32.mxu0 %vm8309_vm1, %v8310_v6 }
 0x1cd   : > { %7258 = vmatprep.subr.msk.mxu0 %vm2149_vm4, %v2028_v5  ;;  %7846 = vmatprep.subr.msk.mxu1 %vm2149_vm4, %v8838_v47 }
 0x1ce   : > { %7190 = vmatmul.mubr.msk.f32.gmra.mrb[32].mxu1 %vm835_vm3, %v8540_v12  ;;  %7209 = vmatmul.mubr.msk.f32.gmra.mrb[34].mxu0 %vm835_vm3, %v8540_v12 }
 0x1cf   : > { %7192 = vmatprep.mubr.msk.f32.mxu1 %vm8309_vm1, %v8310_v6  ;;  %7211 = vmatprep.mubr.msk.f32.mxu0 %vm8309_vm1, %v8310_v6 }
 0x1d2   : > { %7193 = vmatmul.mubr.msk.f32.gmra.mrb[34].mxu1 %vm835_vm3, %v8584_v57  ;;  %7212 = vmatmul.mubr.msk.f32.gmra.mrb[36].mxu0 %vm835_vm3, %v8584_v57 }
 0x1d3   : > { %7195 = vmatprep.mubr.msk.f32.mxu1 %vm8309_vm1, %v8310_v6  ;;  %7214 = vmatprep.mubr.msk.f32.mxu0 %vm8309_vm1, %v8310_v6 }
 0x1d6   : > { %7196 = vmatmul.mubr.msk.f32.gmra.mrb[36].mxu1 %vm835_vm3, %v8619_v20  ;;  %7215 = vmatmul.mubr.msk.f32.gmra.mrb[38].mxu0 %vm835_vm3, %v8619_v20 }
 0x1d7   : > { %7198 = vmatprep.mubr.msk.f32.mxu1 %vm8309_vm1, %v8310_v6  ;;  %7217 = vmatprep.mubr.msk.f32.mxu0 %vm8309_vm1, %v8310_v6 }
 0x1da   : > { %7199 = vmatmul.mubr.msk.f32.gmra.mrb[38].mxu1 %vm835_vm3, %v8638_v32  ;;  %7218 = vmatmul.mubr.msk.f32.gmra.mrb[40].mxu0 %vm835_vm3, %v8638_v32 }
 0x1db   : > { %7224 = vmatprep.mubr.msk.f32.mxu1 %vm8309_vm1, %v8310_v6  ;;  %7243 = vmatprep.mubr.msk.f32.mxu0 %vm8309_vm1, %v8310_v6 }
 0x1de   : > { %7225 = vmatmul.mubr.msk.f32.vlgmr.msra.gmra.mrb[40].mxu1 %vm835_vm3, %v8519_v42  ;;  %7244 = vmatmul.mubr.msk.f32.vlgmr.msra.gmra.mrb[42].mxu0 %vm835_vm3, %v8519_v42  ;;  %v6282_v42 = vld [vmem:[%s10018_s3 + $0x4] sm:$0xf] }
 0x1df   : > { %7227 = vmatprep.mubr.msk.f32.mxu1 %vm8309_vm1, %v8310_v6  ;;  %7246 = vmatprep.mubr.msk.f32.mxu0 %vm8309_vm1, %v8310_v6 }
 0x1e0   : > { %7259 = vmatpush3.msk.msra.mxu0 %vm2149_vm4, %v2028_v5  ;;  %7847 = vmatpush3.msk.msra.mxu1 %vm2149_vm4, %v8838_v47 }
 0x1e1   : > { %7320 = vmatprep.subr.msk.mxu0 %vm2149_vm4, %v6282_v42 }
 0x1e2   : > { %7228 = vmatmul.mubr.msk.f32.gmra.mrb[42].mxu1 %vm835_vm3, %v8540_v12  ;;  %7247 = vmatmul.mubr.msk.f32.gmra.mrb[44].mxu0 %vm835_vm3, %v8540_v12 }
 0x1e3   : > { %7230 = vmatprep.mubr.msk.f32.mxu1 %vm8309_vm1, %v8310_v6  ;;  %7249 = vmatprep.mubr.msk.f32.mxu0 %vm8309_vm1, %v8310_v6 }
 0x1e6   : > { %7231 = vmatmul.mubr.msk.f32.gmra.mrb[44].mxu1 %vm835_vm3, %v8584_v57  ;;  %7250 = vmatmul.mubr.msk.f32.gmra.mrb[46].mxu0 %vm835_vm3, %v8584_v57 }
 0x1e7   : > { %7233 = vmatprep.mubr.msk.f32.mxu1 %vm8309_vm1, %v8310_v6  ;;  %7252 = vmatprep.mubr.msk.f32.mxu0 %vm8309_vm1, %v8310_v6 }
 0x1ea   : > { %7234 = vmatmul.mubr.msk.f32.gmra.mrb[46].mxu1 %vm835_vm3, %v8619_v20  ;;  %7253 = vmatmul.mubr.msk.f32.gmra.mrb[48].mxu0 %vm835_vm3, %v8619_v20 }
 0x1eb   : > { %7236 = vmatprep.mubr.msk.f32.mxu1 %vm8309_vm1, %v8310_v6  ;;  %7255 = vmatprep.mubr.msk.f32.mxu0 %vm8309_vm1, %v8310_v6  ;;  %v8847_v6 = vld [vmem:[%s10018_s3 + $0x14] sm:$0xf] }
 0x1ec   : > { %7568 = vmatprep.subr.msk.mxu1 %vm2149_vm4, %v8847_v6 }
 0x1ee   : > { %7237 = vmatmul.mubr.msk.f32.gmra.mrb[48].mxu1 %vm835_vm3, %v8638_v32  ;;  %7256 = vmatmul.mubr.msk.f32.gmra.mrb[50].mxu0 %vm835_vm3, %v8638_v32 }
 0x261   : > { %v917_v12 = vpop.f32.mrb[0].mxu1  ;;  %v1032_v10 = vpop.f32.mrb[2].mxu0 }
 0x262   : > { %941 = vst.msk [vmem:[#allocation2] sm:$0xff] %vm279_vm2, %v917_v12  ;;  %v7074_v11 = vpop.f32.mrb[1].mxu1  ;;  %1056 = vst.msk [vmem:[#allocation2 + $0x28] sm:$0xff] %vm279_vm2, %v1032_v10  ;;  %v7093_v13 = vpop.f32.mrb[3].mxu0 }
 0x265   : > { %v922_v18 = vpop.f32.mrb[2].mxu1  ;;  %v1037_v55 = vpop.f32.mrb[4].mxu0 }
 0x266   : > { %942 = vst.msk [vmem:[#allocation2 + $0x8] sm:$0xff] %vm279_vm2, %v922_v18  ;;  %v7077_v56 = vpop.f32.mrb[3].mxu1  ;;  %1057 = vst.msk [vmem:[#allocation2 + $0x30] sm:$0xff] %vm279_vm2, %v1037_v55  ;;  %v7096_v57 = vpop.f32.mrb[5].mxu0 }
 0x269   : > { %v927_v58 = vpop.f32.mrb[4].mxu1  ;;  %v1988_v59 = vld [vmem:[#allocation2] sm:$0xff]  ;;  %v1042_v60 = vpop.f32.mrb[6].mxu0  ;;  %v1993_v38 = vld [vmem:[#allocation2 + $0x28] sm:$0xff] }
 0x26a   : > { %943 = vst.msk [vmem:[#allocation2 + $0x10] sm:$0xff] %vm279_vm2, %v927_v58  ;;  %v7080_v61 = vpop.f32.mrb[5].mxu1  ;;  %7260 = vmatprep.mubr.msk.f32.mxu0 %vm279_vm2, %v1988_v59  ;;  %1058 = vst.msk [vmem:[#allocation2 + $0x38] sm:$0xff] %vm279_vm2, %v1042_v60  ;;  %v7099_v62 = vpop.f32.mrb[7].mxu0 }
 0x26d   : > { %v932_v63 = vpop.f32.mrb[6].mxu1  ;;  %v1989_v0 = vld [vmem:[#allocation2 + $0x8] sm:$0xff]  ;;  %v1047_v1 = vpop.f32.mrb[8].mxu0  ;;  %v1994_v40 = vld [vmem:[#allocation2 + $0x30] sm:$0xff] }
 0x26e   : > { %944 = vst.msk [vmem:[#allocation2 + $0x18] sm:$0xff] %vm279_vm2, %v932_v63  ;;  %v7083_v2 = vpop.f32.mrb[7].mxu1  ;;  %7261 = vmatmul.mubr.msk.f32.vlgmr.msra.gmra.mrb[52].mxu0 %vm279_vm2, %v1989_v0  ;;  %1059 = vst.msk [vmem:[#allocation2 + $0x40] sm:$0xff] %vm279_vm2, %v1047_v1  ;;  %v7102_v15 = vpop.f32.mrb[9].mxu0 }
 0x26f   : > { %7321 = vmatpush3.msk.msra.mxu0 %vm2149_vm4, %v6282_v42 }
 0x270   : > { %7382 = vmatprep.subr.msk.mxu0 %vm2149_vm4, %v8875_v30 }
 0x271   : > { %v937_v16 = vpop.f32.mrb[8].mxu1  ;;  %v1990_v17 = vld [vmem:[#allocation2 + $0x10] sm:$0xff]  ;;  %v1052_v20 = vpop.f32.mrb[10].mxu0  ;;  %v1995_v25 = vld [vmem:[#allocation2 + $0x38] sm:$0xff] }
 0x272   : > { %945 = vst.msk [vmem:[#allocation2 + $0x20] sm:$0xff] %vm279_vm2, %v937_v16  ;;  %v7086_v21 = vpop.f32.mrb[9].mxu1  ;;  %7263 = vmatprep.mubr.msk.f32.mxu0 %vm279_vm2, %v1990_v17  ;;  %1060 = vst.msk [vmem:[#allocation2 + $0x48] sm:$0xff] %vm279_vm2, %v1052_v20  ;;  %v7105_v22 = vpop.f32.mrb[11].mxu0 }
 0x275   : > { %v1147_v3 = vpop.f32.mrb[10].mxu1  ;;  %v1991_v26 = vld [vmem:[#allocation2 + $0x18] sm:$0xff]  ;;  %v1262_v27 = vpop.f32.mrb[12].mxu0  ;;  %v1996_v43 = vld [vmem:[#allocation2 + $0x40] sm:$0xff] }
 0x276   : > { %1171 = vst.msk [vmem:[#allocation2 + $0x50] sm:$0xff] %vm279_vm2, %v1147_v3  ;;  %v7112_v28 = vpop.f32.mrb[11].mxu1  ;;  %7264 = vmatmul.mubr.msk.f32.gmra.mrb[54].mxu0 %vm279_vm2, %v1991_v26  ;;  %1286 = vst.msk [vmem:[#allocation2 + $0x78] sm:$0xff] %vm279_vm2, %v1262_v27  ;;  %v7131_v29 = vpop.f32.mrb[13].mxu0 }
 0x279   : > { %v1152_v31 = vpop.f32.mrb[12].mxu1  ;;  %v1992_v32 = vld [vmem:[#allocation2 + $0x20] sm:$0xff]  ;;  %v1267_v35 = vpop.f32.mrb[14].mxu0  ;;  %v1997_v49 = vld [vmem:[#allocation2 + $0x48] sm:$0xff] }
 0x27a   : > { %1172 = vst.msk [vmem:[#allocation2 + $0x58] sm:$0xff] %vm279_vm2, %v1152_v31  ;;  %v7115_v37 = vpop.f32.mrb[13].mxu1  ;;  %7266 = vmatprep.mubr.msk.f32.mxu0 %vm279_vm2, %v1992_v32  ;;  %1287 = vst.msk [vmem:[#allocation2 + $0x80] sm:$0xff] %vm279_vm2, %v1267_v35  ;;  %v7134_v39 = vpop.f32.mrb[15].mxu0 }
 0x27b   : > { %7267 = vmatmul.mubr.msk.f32.gmra.mrb[56].mxu0 %vm279_vm2, %v1993_v38 }
 0x27c   : > { %7269 = vmatprep.mubr.msk.f32.mxu0 %vm279_vm2, %v1994_v40 }
 0x27d   : > { %v1157_v41 = vpop.f32.mrb[14].mxu1  ;;  %v1272_v45 = vpop.f32.mrb[16].mxu0  ;;  %v8891_v36 = vld [vmem:[#allocation2 + $0x50] sm:$0xff]  ;;  %v8916_v10 = vld [vmem:[#allocation2 + $0x78] sm:$0xff] }
 0x27e   : > { %1173 = vst.msk [vmem:[#allocation2 + $0x60] sm:$0xff] %vm279_vm2, %v1157_v41  ;;  %v7118_v46 = vpop.f32.mrb[15].mxu1  ;;  %1288 = vst.msk [vmem:[#allocation2 + $0x88] sm:$0xff] %vm279_vm2, %v1272_v45  ;;  %v7137_v48 = vpop.f32.mrb[17].mxu0  ;;  %v8986_v45 = vld [vmem:[%s10018_s3 + $0x18] sm:$0xf] }
 0x27f   : > { %7270 = vmatmul.mubr.msk.f32.gmra.mrb[58].mxu0 %vm279_vm2, %v1995_v25 }
 0x280   : > { %7272 = vmatprep.mubr.msk.f32.mxu0 %vm279_vm2, %v1996_v43 }
 0x281   : > { %v1162_v50 = vpop.f32.mrb[16].mxu1  ;;  %v1277_v51 = vpop.f32.mrb[18].mxu0  ;;  %v8896_v14 = vld [vmem:[#allocation2 + $0x58] sm:$0xff]  ;;  %v8921_v13 = vld [vmem:[#allocation2 + $0x80] sm:$0xff] }
 0x282   : > { %1174 = vst.msk [vmem:[#allocation2 + $0x68] sm:$0xff] %vm279_vm2, %v1162_v50  ;;  %v7121_v52 = vpop.f32.mrb[17].mxu1  ;;  %1289 = vst.msk [vmem:[#allocation2 + $0x90] sm:$0xff] %vm279_vm2, %v1277_v51  ;;  %v7140_v53 = vpop.f32.mrb[19].mxu0 }
 0x283   : > { %7273 = vmatmul.mubr.msk.f32.gmra.mrb[60].mxu0 %vm279_vm2, %v1997_v49 }
 0x284   : > { %7275 = vmatprep.mubr.msk.f32.mxu0 %vm279_vm2, %v8891_v36 }
 0x285   : > { %v1167_v34 = vpop.f32.mrb[18].mxu1  ;;  %v1282_v44 = vpop.f32.mrb[20].mxu0  ;;  %v8901_v23 = vld [vmem:[#allocation2 + $0x60] sm:$0xff]  ;;  %v8928_v58 = vld [vmem:[#allocation2 + $0x88] sm:$0xff] }
 0x286   : > { %1175 = vst.msk [vmem:[#allocation2 + $0x70] sm:$0xff] %vm279_vm2, %v1167_v34  ;;  %v7124_v54 = vpop.f32.mrb[19].mxu1  ;;  %1290 = vst.msk [vmem:[#allocation2 + $0x98] sm:$0xff] %vm279_vm2, %v1282_v44  ;;  %v7143_v19 = vpop.f32.mrb[21].mxu0 }
 0x287   : > { %7276 = vmatmul.mubr.msk.f32.gmra.mrb[62].mxu0 %vm279_vm2, %v8896_v14 }
 0x288   : > { %7278 = vmatprep.mubr.msk.f32.mxu0 %vm279_vm2, %v8901_v23 }
 0x289   : > { %v1377_v24 = vpop.f32.mrb[20].mxu1  ;;  %v8905_v33 = vld [vmem:[#allocation2 + $0x68] sm:$0xff]  ;;  %v1492_v7 = vpop.f32.mrb[22].mxu0  ;;  %v8925_v55 = vld [vmem:[#allocation2 + $0x90] sm:$0xff] }
 0x28a   : > { %1401 = vst.msk [vmem:[#allocation2 + $0xa0] sm:$0xff] %vm279_vm2, %v1377_v24  ;;  %v7150_v4 = vpop.f32.mrb[21].mxu1  ;;  %1516 = vst.msk [vmem:[#allocation2 + $0xc8] sm:$0xff] %vm279_vm2, %v1492_v7  ;;  %v7169_v8 = vpop.f32.mrb[23].mxu0 }
 0x28b   : > { %7279 = vmatmul.mubr.msk.f32.gmra.mrb[64].mxu0 %vm279_vm2, %v8905_v33 }
 0x28d   : > { %v1382_v9 = vpop.f32.mrb[22].mxu1  ;;  %v8911_v5 = vld [vmem:[#allocation2 + $0x70] sm:$0xff]  ;;  %v1497_v42 = vpop.f32.mrb[24].mxu0  ;;  %v8935_v60 = vld [vmem:[#allocation2 + $0x98] sm:$0xff] }
 0x28e   : > { %1402 = vst.msk [vmem:[#allocation2 + $0xa8] sm:$0xff] %vm279_vm2, %v1382_v9  ;;  %v7153_v12 = vpop.f32.mrb[23].mxu1  ;;  %7281 = vmatprep.mubr.msk.f32.mxu0 %vm279_vm2, %v8911_v5  ;;  %1517 = vst.msk [vmem:[#allocation2 + $0xd0] sm:$0xff] %vm279_vm2, %v1497_v42  ;;  %v7172_v11 = vpop.f32.mrb[25].mxu0 }
 0x28f   : > { %7282 = vmatmul.mubr.msk.f32.gmra.mrb[66].mxu0 %vm279_vm2, %v8916_v10 }
 0x290   : > { %7284 = vmatprep.mubr.msk.f32.mxu0 %vm279_vm2, %v8921_v13 }
 0x291   : > { %v1387_v18 = vpop.f32.mrb[24].mxu1  ;;  %v1502_v56 = vpop.f32.mrb[26].mxu0  ;;  %v8941_v1 = vld [vmem:[#allocation2 + $0xa0] sm:$0xff]  ;;  %v8972_v39 = vld [vmem:[#allocation2 + $0xc8] sm:$0xff] }
 0x292   : > { %1403 = vst.msk [vmem:[#allocation2 + $0xb0] sm:$0xff] %vm279_vm2, %v1387_v18  ;;  %v7156_v57 = vpop.f32.mrb[25].mxu1  ;;  %1518 = vst.msk [vmem:[#allocation2 + $0xd8] sm:$0xff] %vm279_vm2, %v1502_v56  ;;  %v7175_v59 = vpop.f32.mrb[27].mxu0 }
 0x293   : > { %7285 = vmatmul.mubr.msk.f32.gmra.mrb[68].mxu0 %vm279_vm2, %v8928_v58 }
 0x294   : > { %7287 = vmatprep.mubr.msk.f32.mxu0 %vm279_vm2, %v8925_v55 }
 0x295   : > { %v1392_v61 = vpop.f32.mrb[26].mxu1  ;;  %v1507_v62 = vpop.f32.mrb[28].mxu0  ;;  %v8946_v17 = vld [vmem:[#allocation2 + $0xa8] sm:$0xff]  ;;  %v8979_v41 = vld [vmem:[#allocation2 + $0xd0] sm:$0xff] }
 0x296   : > { %1404 = vst.msk [vmem:[#allocation2 + $0xb8] sm:$0xff] %vm279_vm2, %v1392_v61  ;;  %v7159_v63 = vpop.f32.mrb[27].mxu1  ;;  %1519 = vst.msk [vmem:[#allocation2 + $0xe0] sm:$0xff] %vm279_vm2, %v1507_v62  ;;  %v7178_v0 = vpop.f32.mrb[29].mxu0  ;;  %v8981_v43 = vld [vmem:[#allocation2 + $0xc9] sm:$0xff] }
 0x297   : > { %7288 = vmatmul.mubr.msk.f32.gmra.mrb[70].mxu0 %vm279_vm2, %v8935_v60 }
 0x298   : > { %7290 = vmatprep.mubr.msk.f32.mxu0 %vm279_vm2, %v8941_v1 }
 0x299   : > { %v1397_v2 = vpop.f32.mrb[28].mxu1  ;;  %v1512_v15 = vpop.f32.mrb[30].mxu0  ;;  %v8951_v21 = vld [vmem:[#allocation2 + $0xb0] sm:$0xff]  ;;  %v8997_v50 = vld [vmem:[#allocation2 + $0xd8] sm:$0xff] }
 0x29a   : > { %1405 = vst.msk [vmem:[#allocation2 + $0xc0] sm:$0xff] %vm279_vm2, %v1397_v2  ;;  %v7162_v16 = vpop.f32.mrb[29].mxu1  ;;  %1520 = vst.msk [vmem:[#allocation2 + $0xe8] sm:$0xff] %vm279_vm2, %v1512_v15  ;;  %v7181_v20 = vpop.f32.mrb[31].mxu0  ;;  %v8999_v51 = vld [vmem:[#allocation2 + $0xd1] sm:$0xff] }
 0x29b   : > { %7291 = vmatmul.mubr.msk.f32.gmra.mrb[72].mxu0 %vm279_vm2, %v8946_v17 }
 0x29c   : > { %7293 = vmatprep.mubr.msk.f32.mxu0 %vm279_vm2, %v8951_v21 }
 0x29d   : > { %v1607_v22 = vpop.f32.mrb[30].mxu1  ;;  %v8955_v3 = vld [vmem:[#allocation2 + $0xb8] sm:$0xff]  ;;  %v1722_v26 = vpop.f32.mrb[32].mxu0  ;;  %v8994_v25 = vld [vmem:[#allocation2 + $0xe0] sm:$0xff] }
 0x29e   : > { %1631 = vst.msk [vmem:[#allocation2 + $0xf0] sm:$0xff] %vm279_vm2, %v1607_v22  ;;  %v7188_v27 = vpop.f32.mrb[31].mxu1  ;;  %1746 = vst.msk [vmem:[#allocation2 + $0x118] sm:$0xff] %vm279_vm2, %v1722_v26  ;;  %v7207_v28 = vpop.f32.mrb[33].mxu0 }
 0x29f   : > { %7294 = vmatmul.mubr.msk.f32.gmra.mrb[74].mxu0 %vm279_vm2, %v8955_v3 }
 0x2a1   : > { %v1612_v29 = vpop.f32.mrb[32].mxu1  ;;  %v8961_v31 = vld [vmem:[#allocation2 + $0xc0] sm:$0xff]  ;;  %v1727_v37 = vpop.f32.mrb[34].mxu0  ;;  %v9014_v53 = vld [vmem:[#allocation2 + $0xe8] sm:$0xff] }
 0x2a2   : > { %v8963_v32 = vld [vmem:[#allocation2 + $0xb9] sm:$0xff]  ;;  %v8965_v35 = vld [vmem:[#allocation2 + $0xc1] sm:$0xff]  ;;  %1632 = vst.msk [vmem:[#allocation2 + $0xf8] sm:$0xff] %vm279_vm2, %v1612_v29  ;;  %v7191_v38 = vpop.f32.mrb[33].mxu1  ;;  %7296 = vmatprep.mubr.msk.f32.mxu0 %vm279_vm2, %v8961_v31  ;;  %1747 = vst.msk [vmem:[#allocation2 + $0x120] sm:$0xff] %vm279_vm2, %v1727_v37  ;;  %v7210_v40 = vpop.f32.mrb[35].mxu0 }
 0x2a3   : > { %7535 = vmatprep.mubr.msk.f32.mxu1 %vm279_vm2, %v8963_v32  ;;  %7297 = vmatmul.mubr.msk.f32.gmra.mrb[76].mxu0 %vm279_vm2, %v8972_v39  ;;  %v9017_v19 = vld [vmem:[#allocation2 + $0xe1] sm:$0xff] }
 0x2a4   : > { %7536 = vmatmul.mubr.msk.f32.vlgmr.msra.gmra.mrb[50].mxu1 %vm279_vm2, %v8965_v35  ;;  %7299 = vmatprep.mubr.msk.f32.mxu0 %vm279_vm2, %v8979_v41 }
 0x2a5   : > { %7538 = vmatprep.mubr.msk.f32.mxu1 %vm279_vm2, %v8981_v43  ;;  %7569 = vmatpush3.msk.msra.mxu1 %vm2149_vm4, %v8847_v6  ;;  %v1617_v46 = vpop.f32.mrb[34].mxu1  ;;  %v1732_v48 = vpop.f32.mrb[36].mxu0  ;;  %v9008_v6 = vld [vmem:[#allocation2 + $0xd9] sm:$0xff]  ;;  %v9024_v7 = vld [vmem:[#allocation2 + $0xf0] sm:$0xff] }
 0x2a6   : > { %1633 = vst.msk [vmem:[#allocation2 + $0x100] sm:$0xff] %vm279_vm2, %v1617_v46  ;;  %v7194_v49 = vpop.f32.mrb[35].mxu1  ;;  %1748 = vst.msk [vmem:[#allocation2 + $0x128] sm:$0xff] %vm279_vm2, %v1732_v48  ;;  %v7213_v52 = vpop.f32.mrb[37].mxu0  ;;  %7630 = vmatprep.subr.msk.mxu1 %vm2149_vm4, %v8986_v45  ;;  %v9026_v4 = vld [vmem:[#allocation2 + $0xe9] sm:$0xff]  ;;  %v9071_v28 = vld [vmem:[#allocation2 + $0x118] sm:$0xff] }
 0x2a7   : > { %7300 = vmatmul.mubr.msk.f32.gmra.mrb[78].mxu0 %vm279_vm2, %v8997_v50  ;;  %10098 = vst [vmem:[#allocation9_spill] sm:$0xff] %v9071_v28 }
 0x2a8   : > { %7539 = vmatmul.mubr.msk.f32.gmra.mrb[52].mxu1 %vm279_vm2, %v8999_v51  ;;  %7302 = vmatprep.mubr.msk.f32.mxu0 %vm279_vm2, %v8994_v25 }
 0x2a9   : > { %7541 = vmatprep.mubr.msk.f32.mxu1 %vm279_vm2, %v9008_v6  ;;  %v1622_v34 = vpop.f32.mrb[36].mxu1  ;;  %v1737_v44 = vpop.f32.mrb[38].mxu0  ;;  %v9033_v12 = vld [vmem:[#allocation2 + $0xf8] sm:$0xff]  ;;  %v9078_v37 = vld [vmem:[#allocation2 + $0x120] sm:$0xff] }
 0x2aa   : > { %1634 = vst.msk [vmem:[#allocation2 + $0x108] sm:$0xff] %vm279_vm2, %v1622_v34  ;;  %v7197_v54 = vpop.f32.mrb[37].mxu1  ;;  %1749 = vst.msk [vmem:[#allocation2 + $0x130] sm:$0xff] %vm279_vm2, %v1737_v44  ;;  %v7216_v24 = vpop.f32.mrb[39].mxu0  ;;  %v9035_v11 = vld [vmem:[#allocation2 + $0xf1] sm:$0xff]  ;;  %v9080_v38 = vld [vmem:[#allocation2 + $0x119] sm:$0xff] }
 0x2ab   : > { %7303 = vmatmul.mubr.msk.f32.gmra.mrb[80].mxu0 %vm279_vm2, %v9014_v53  ;;  %10092 = vst [vmem:[#allocation3_spill] sm:$0xff] %v9035_v11  ;;  %10099 = vst [vmem:[#allocation10_spill] sm:$0xff] %v9078_v37 }
 0x2ac   : > { %7542 = vmatmul.mubr.msk.f32.gmra.mrb[54].mxu1 %vm279_vm2, %v9017_v19  ;;  %7305 = vmatprep.mubr.msk.f32.mxu0 %vm279_vm2, %v9024_v7  ;;  %10100 = vst [vmem:[#allocation11_spill] sm:$0xff] %v9080_v38 }
 0x2ad   : > { %7544 = vmatprep.mubr.msk.f32.mxu1 %vm279_vm2, %v9026_v4  ;;  %v1627_v8 = vpop.f32.mrb[38].mxu1  ;;  %v1742_v9 = vpop.f32.mrb[40].mxu0  ;;  %v9042_v56 = vld [vmem:[#allocation2 + $0x100] sm:$0xff]  ;;  %v9089_v49 = vld [vmem:[#allocation2 + $0x128] sm:$0xff] }
 0x2ae   : > { %1635 = vst.msk [vmem:[#allocation2 + $0x110] sm:$0xff] %vm279_vm2, %v1627_v8  ;;  %v7200_v42 = vpop.f32.mrb[39].mxu1  ;;  %1750 = vst.msk [vmem:[#allocation2 + $0x138] sm:$0xff] %vm279_vm2, %v1742_v9  ;;  %v7219_v18 = vpop.f32.mrb[41].mxu0  ;;  %v9044_v57 = vld [vmem:[#allocation2 + $0xf9] sm:$0xff]  ;;  %v9091_v52 = vld [vmem:[#allocation2 + $0x121] sm:$0xff] }
 0x2af   : > { %7306 = vmatmul.mubr.msk.f32.gmra.mrb[82].mxu0 %vm279_vm2, %v9033_v12  ;;  %10093 = vst [vmem:[#allocation4_spill] sm:$0xff] %v9044_v57  ;;  %10102 = vst [vmem:[#allocation13_spill] sm:$0xff] %v9089_v49  ;;  %v2410_v9 = vld [vmem:[#allocation2 + $0x1] sm:$0xff] }
 0x2b0   : > { %7545 = vmatmul.mubr.msk.f32.gmra.mrb[56].mxu1 %vm279_vm2, %v9035_v11  ;;  %7308 = vmatprep.mubr.msk.f32.mxu0 %vm279_vm2, %v9042_v56  ;;  %10103 = vst [vmem:[#allocation14_spill] sm:$0xff] %v9091_v52 }
 0x2b1   : > { %7547 = vmatprep.mubr.msk.f32.mxu1 %vm279_vm2, %v9044_v57  ;;  %v1837_v59 = vpop.f32.mrb[40].mxu1  ;;  %v9050_v61 = vld [vmem:[#allocation2 + $0x108] sm:$0xff]  ;;  %v1952_v63 = vpop.f32.mrb[42].mxu0  ;;  %v9086_v46 = vld [vmem:[#allocation2 + $0x130] sm:$0xff] }
 0x2b2   : > { %v9052_v62 = vld [vmem:[#allocation2 + $0x101] sm:$0xff]  ;;  %1861 = vst.msk [vmem:[#allocation2 + $0x140] sm:$0xff] %vm279_vm2, %v1837_v59  ;;  %v7226_v0 = vpop.f32.mrb[41].mxu1  ;;  %1976 = vst.msk [vmem:[#allocation2 + $0x168] sm:$0xff] %vm279_vm2, %v1952_v63  ;;  %v7245_v2 = vpop.f32.mrb[43].mxu0  ;;  %v9097_v34 = vld [vmem:[#allocation2 + $0x129] sm:$0xff] }
 0x2b3   : > { %10094 = vst [vmem:[#allocation5_spill] sm:$0xff] %v9052_v62  ;;  %7309 = vmatmul.mubr.msk.f32.gmra.mrb[84].mxu0 %vm279_vm2, %v9050_v61  ;;  %10101 = vst [vmem:[#allocation12_spill] sm:$0xff] %v9086_v46  ;;  %v2411_v63 = vld [vmem:[#allocation2 + $0x9] sm:$0xff]  ;;  %v2412_v2 = vld [vmem:[#allocation2 + $0x11] sm:$0xff] }
 0x2b4   : > { %7548 = vmatmul.mubr.msk.f32.gmra.mrb[58].mxu1 %vm279_vm2, %v9052_v62  ;;  %10104 = vst [vmem:[#allocation15_spill] sm:$0xff] %v9097_v34 }
 0x2b5   : > { %v1842_v15 = vpop.f32.mrb[42].mxu1  ;;  %v9060_v16 = vld [vmem:[#allocation2 + $0x110] sm:$0xff]  ;;  %v1957_v26 = vpop.f32.mrb[44].mxu0  ;;  %v9103_v44 = vld [vmem:[#allocation2 + $0x138] sm:$0xff] }
 0x2b6   : > { %10095 = vst [vmem:[#allocation6_spill] sm:$0xff] %v9060_v16  ;;  %v9062_v20 = vld [vmem:[#allocation2 + $0x109] sm:$0xff]  ;;  %v9064_v22 = vld [vmem:[#allocation2 + $0x111] sm:$0xff]  ;;  %1862 = vst.msk [vmem:[#allocation2 + $0x148] sm:$0xff] %vm279_vm2, %v1842_v15  ;;  %v7229_v27 = vpop.f32.mrb[43].mxu1  ;;  %7311 = vmatprep.mubr.msk.f32.mxu0 %vm279_vm2, %v9060_v16  ;;  %v7248_v29 = vpop.f32.mrb[45].mxu0 }
 0x2b7   : > { %10096 = vst [vmem:[#allocation7_spill] sm:$0xff] %v9062_v20  ;;  %10097 = vst [vmem:[#allocation8_spill] sm:$0xff] %v9064_v22  ;;  %7550 = vmatprep.mubr.msk.f32.mxu1 %vm279_vm2, %v9062_v20  ;;  %7312 = vmatmul.mubr.msk.f32.gmra.mrb[86].mxu0 %vm279_vm2, %v9071_v28  ;;  %v9106_v8 = vld [vmem:[#allocation2 + $0x131] sm:$0xff]  ;;  %v2413_v27 = vld [vmem:[#allocation2 + $0x19] sm:$0xff] }
 0x2b8   : > { %1977 = vst.msk [vmem:[#allocation2 + $0x170] sm:$0xff] %vm279_vm2, %v1957_v26  ;;  %7551 = vmatmul.mubr.msk.f32.gmra.mrb[60].mxu1 %vm279_vm2, %v9064_v22  ;;  %7314 = vmatprep.mubr.msk.f32.mxu0 %vm279_vm2, %v9078_v37  ;;  %10105 = vst [vmem:[#allocation16_spill] sm:$0xff] %v9103_v44  ;;  %v2414_v29 = vld [vmem:[#allocation2 + $0x21] sm:$0xff]  ;;  %v9297_v16 = vld [vmem:[#allocation2 + $0xaa] sm:$0xff] }
 0x2b9   : > { %7553 = vmatprep.mubr.msk.f32.mxu1 %vm279_vm2, %v9080_v38  ;;  %v1847_v40 = vpop.f32.mrb[44].mxu1  ;;  %10106 = vst [vmem:[#allocation17_spill] sm:$0xff] %v9106_v8  ;;  %v9112_v42 = vld [vmem:[#allocation2 + $0x139] sm:$0xff]  ;;  %v9289_v28 = vld [vmem:[#allocation2 + $0xa2] sm:$0xff] }
 0x2ba   : > { %1863 = vst.msk [vmem:[#allocation2 + $0x150] sm:$0xff] %vm279_vm2, %v1847_v40  ;;  %v7232_v48 = vpop.f32.mrb[45].mxu1  ;;  %10107 = vst [vmem:[#allocation18_spill] sm:$0xff] %v9112_v42  ;;  %v9139_v40 = vld [vmem:[%s10018_s3 + $0xc] sm:$0xf]  ;;  %v9281_v37 = vld [vmem:[#allocation2 + $0x9a] sm:$0xff] }
 0x2bb   : > { %7315 = vmatmul.mubr.msk.f32.gmra.mrb[88].mxu0 %vm279_vm2, %v9089_v49  ;;  %v9273_v49 = vld [vmem:[#allocation2 + $0x92] sm:$0xff] }
 0x2bc   : > { %7554 = vmatmul.mubr.msk.f32.gmra.mrb[62].mxu1 %vm279_vm2, %v9091_v52  ;;  %7317 = vmatprep.mubr.msk.f32.mxu0 %vm279_vm2, %v9086_v46  ;;  %v9265_v46 = vld [vmem:[#allocation2 + $0x8a] sm:$0xff] }
 0x2bd   : > { %7556 = vmatprep.mubr.msk.f32.mxu1 %vm279_vm2, %v9097_v34  ;;  %v1852_v54 = vpop.f32.mrb[46].mxu1  ;;  %v9118_v0 = vld [vmem:[#allocation2 + $0x141] sm:$0xff] }
 0x2be   : > { %1864 = vst.msk [vmem:[#allocation2 + $0x158] sm:$0xff] %vm279_vm2, %v1852_v54  ;;  %v7235_v24 = vpop.f32.mrb[47].mxu1  ;;  %10108 = vst [vmem:[#allocation19_spill] sm:$0xff] %v9118_v0 }
 0x2bf   : > { %7318 = vmatmul.mubr.msk.f32.gmra.mrb[90].mxu0 %vm279_vm2, %v9103_v44  ;;  %v9155_v24 = vld [vmem:[#allocation2 + $0x31] sm:$0xff]  ;;  %v9247_v44 = vld [vmem:[#allocation2 + $0x81] sm:$0xff] }
 0x2c0   : > { %7557 = vmatmul.mubr.msk.f32.gmra.mrb[64].mxu1 %vm279_vm2, %v9106_v8  ;;  %7322 = vmatprep.mubr.msk.f32.mxu0 %vm279_vm2, %v2410_v9  ;;  %10114 = vst [vmem:[#allocation25_spill] sm:$0xff] %v9155_v24  ;;  %v9157_v9 = vld [vmem:[#allocation2 + $0x2a] sm:$0xff]  ;;  %10124 = vst [vmem:[#allocation35_spill] sm:$0xff] %v9247_v44 }
 0x2c1   : > { %7559 = vmatprep.mubr.msk.f32.mxu1 %vm279_vm2, %v9112_v42  ;;  %v1857_v18 = vpop.f32.mrb[48].mxu1  ;;  %v9123_v15 = vld [vmem:[#allocation2 + $0x149] sm:$0xff] }
 0x2c2   : > { %1865 = vst.msk [vmem:[#allocation2 + $0x160] sm:$0xff] %vm279_vm2, %v1857_v18  ;;  %v7238_v59 = vpop.f32.mrb[49].mxu1  ;;  %10109 = vst [vmem:[#allocation20_spill] sm:$0xff] %v9123_v15  ;;  %v9163_v18 = vld [vmem:[#allocation2 + $0x39] sm:$0xff] }
 0x2c3   : > { %7323 = vmatmul.mubr.msk.f32.vlgmr.msra.gmra.mrb[52].mxu0 %vm279_vm2, %v2411_v63  ;;  %10115 = vst [vmem:[#allocation26_spill] sm:$0xff] %v9163_v18  ;;  %v9165_v59 = vld [vmem:[#allocation2 + $0x32] sm:$0xff]  ;;  %v9171_v63 = vld [vmem:[#allocation2 + $0x41] sm:$0xff] }
 0x2c4   : > { %7560 = vmatmul.mubr.msk.f32.gmra.mrb[66].mxu1 %vm279_vm2, %v9118_v0  ;;  %7325 = vmatprep.mubr.msk.f32.mxu0 %vm279_vm2, %v2412_v2  ;;  %10116 = vst [vmem:[#allocation27_spill] sm:$0xff] %v9171_v63  ;;  %v9173_v2 = vld [vmem:[#allocation2 + $0x3a] sm:$0xff]  ;;  %v9224_v0 = vld [vmem:[#allocation2 + $0x62] sm:$0xff] }
 0x2c5   : > { %7562 = vmatprep.mubr.msk.f32.mxu1 %vm279_vm2, %v9123_v15  ;;  %v9128_v26 = vld [vmem:[#allocation2 + $0x151] sm:$0xff]  ;;  %7383 = vmatpush3.msk.msra.mxu0 %vm2149_vm4, %v8875_v30  ;;  %v9149_v30 = vld [vmem:[#allocation2 + $0x29] sm:$0xff] }
 0x2c6   : > { %10110 = vst [vmem:[#allocation21_spill] sm:$0xff] %v9128_v26  ;;  %7444 = vmatprep.subr.msk.mxu0 %vm2149_vm4, %v9139_v40  ;;  %10113 = vst [vmem:[#allocation24_spill] sm:$0xff] %v9149_v30  ;;  %v9222_v15 = vld [vmem:[#allocation2 + $0x69] sm:$0xff] }
 0x2c7   : > { %7326 = vmatmul.mubr.msk.f32.gmra.mrb[54].mxu0 %vm279_vm2, %v2413_v27  ;;  %v9178_v27 = vld [vmem:[%s10018_s3 + $0x1c] sm:$0xf]  ;;  %10121 = vst [vmem:[#allocation32_spill] sm:$0xff] %v9222_v15 }
 0x2c8   : > { %7563 = vmatmul.mubr.msk.f32.gmra.mrb[68].mxu1 %vm279_vm2, %v9128_v26  ;;  %7328 = vmatprep.mubr.msk.f32.mxu0 %vm279_vm2, %v2414_v29  ;;  %v9186_v29 = vld [vmem:[#allocation2 + $0x49] sm:$0xff]  ;;  %v9215_v26 = vld [vmem:[#allocation2 + $0x5a] sm:$0xff] }
 0x2c9   : > { %v9141_v48 = vld [vmem:[#allocation2 + $0x159] sm:$0xff]  ;;  %v9143_v54 = vld [vmem:[#allocation2 + $0x161] sm:$0xff]  ;;  %10117 = vst [vmem:[#allocation28_spill] sm:$0xff] %v9186_v29 }
 0x2ca   : > { %10111 = vst [vmem:[#allocation22_spill] sm:$0xff] %v9141_v48  ;;  %10112 = vst [vmem:[#allocation23_spill] sm:$0xff] %v9143_v54  ;;  %7565 = vmatprep.mubr.msk.f32.mxu1 %vm279_vm2, %v9141_v48  ;;  %v9213_v48 = vld [vmem:[#allocation2 + $0x61] sm:$0xff] }
 0x2cb   : > { %7329 = vmatmul.mubr.msk.f32.gmra.mrb[56].mxu0 %vm279_vm2, %v9149_v30  ;;  %v9205_v30 = vld [vmem:[#allocation2 + $0x59] sm:$0xff]  ;;  %10120 = vst [vmem:[#allocation31_spill] sm:$0xff] %v9213_v48 }
 0x2cc   : > { %7566 = vmatmul.mubr.msk.f32.gmra.mrb[70].mxu1 %vm279_vm2, %v9143_v54  ;;  %7331 = vmatprep.mubr.msk.f32.mxu0 %vm279_vm2, %v9155_v24  ;;  %v9198_v24 = vld [vmem:[#allocation2 + $0x4a] sm:$0xff]  ;;  %10119 = vst [vmem:[#allocation30_spill] sm:$0xff] %v9205_v30 }
 0x2cd   : > { %7570 = vmatprep.mubr.msk.f32.mxu1 %vm279_vm2, %v9157_v9 }
 0x2cf   : > { %7332 = vmatmul.mubr.msk.f32.gmra.mrb[58].mxu0 %vm279_vm2, %v9163_v18  ;;  %v9188_v18 = vld [vmem:[#allocation2 + $0x42] sm:$0xff] }
 0x2d0   : > { %7571 = vmatmul.mubr.msk.f32.vlgmr.msra.gmra.mrb[72].mxu1 %vm279_vm2, %v9165_v59  ;;  %7334 = vmatprep.mubr.msk.f32.mxu0 %vm279_vm2, %v9171_v63  ;;  %v9196_v63 = vld [vmem:[#allocation2 + $0x51] sm:$0xff] }
 0x2d1   : > { %7573 = vmatprep.mubr.msk.f32.mxu1 %vm279_vm2, %v9173_v2  ;;  %7631 = vmatpush3.msk.msra.mxu1 %vm2149_vm4, %v8986_v45  ;;  %10118 = vst [vmem:[#allocation29_spill] sm:$0xff] %v9196_v63  ;;  %v1962_v45 = vpop.f32.mrb[46].mxu0 }
 0x2d2   : > { %7692 = vmatprep.subr.msk.mxu1 %vm2149_vm4, %v9178_v27  ;;  %1978 = vst.msk [vmem:[#allocation2 + $0x178] sm:$0xff] %vm279_vm2, %v1962_v45  ;;  %v7251_v54 = vpop.f32.mrb[47].mxu0 }
 0x2d3   : > { %7335 = vmatmul.mubr.msk.f32.gmra.mrb[60].mxu0 %vm279_vm2, %v9186_v29  ;;  %v9207_v29 = vld [vmem:[#allocation2 + $0x52] sm:$0xff]  ;;  %v1967_v54 = vpop.f32.mrb[48].mxu0 }
 0x2d4   : > { %7574 = vmatmul.mubr.msk.f32.gmra.mrb[74].mxu1 %vm279_vm2, %v9188_v18  ;;  %7337 = vmatprep.mubr.msk.f32.mxu0 %vm279_vm2, %v9196_v63  ;;  %1979 = vst.msk [vmem:[#allocation2 + $0x180] sm:$0xff] %vm279_vm2, %v1967_v54  ;;  %v7254_v45 = vpop.f32.mrb[49].mxu0  ;;  %v9239_v63 = vld [vmem:[#allocation2 + $0x79] sm:$0xff] }
 0x2d5   : > { %7576 = vmatprep.mubr.msk.f32.mxu1 %vm279_vm2, %v9198_v24  ;;  %v1972_v54 = vpop.f32.mrb[50].mxu0  ;;  %10123 = vst [vmem:[#allocation34_spill] sm:$0xff] %v9239_v63 }
 0x2d6   : > { %1980 = vst.msk [vmem:[#allocation2 + $0x188] sm:$0xff] %vm279_vm2, %v1972_v54  ;;  %v7257_v45 = vpop.f32.mrb[51].mxu0  ;;  %v9255_v54 = vld [vmem:[#allocation2 + $0x89] sm:$0xff] }
 0x2d7   : > { %7338 = vmatmul.mubr.msk.f32.gmra.mrb[62].mxu0 %vm279_vm2, %v9205_v30  ;;  %v9230_v30 = vld [vmem:[#allocation2 + $0x71] sm:$0xff]  ;;  %10125 = vst [vmem:[#allocation36_spill] sm:$0xff] %v9255_v54  ;;  %v9257_v45 = vld [vmem:[#allocation2 + $0x82] sm:$0xff] }
 0x2d8   : > { %7577 = vmatmul.mubr.msk.f32.gmra.mrb[76].mxu1 %vm279_vm2, %v9207_v29  ;;  %7340 = vmatprep.mubr.msk.f32.mxu0 %vm279_vm2, %v9213_v48  ;;  %10122 = vst [vmem:[#allocation33_spill] sm:$0xff] %v9230_v30  ;;  %v9232_v48 = vld [vmem:[#allocation2 + $0x6a] sm:$0xff] }
 0x2d9   : > { %7579 = vmatprep.mubr.msk.f32.mxu1 %vm279_vm2, %v9215_v26 }
 0x2db   : > { %7341 = vmatmul.mubr.msk.f32.gmra.mrb[64].mxu0 %vm279_vm2, %v9222_v15  ;;  %v9241_v15 = vld [vmem:[#allocation2 + $0x72] sm:$0xff] }
 0x2dc   : > { %7580 = vmatmul.mubr.msk.f32.gmra.mrb[78].mxu1 %vm279_vm2, %v9224_v0  ;;  %7343 = vmatprep.mubr.msk.f32.mxu0 %vm279_vm2, %v9230_v30  ;;  %v9249_v30 = vld [vmem:[#allocation2 + $0x7a] sm:$0xff] }
 0x2dd   : > { %7582 = vmatprep.mubr.msk.f32.mxu1 %vm279_vm2, %v9232_v48 }
 0x2df   : > { %7344 = vmatmul.mubr.msk.f32.gmra.mrb[66].mxu0 %vm279_vm2, %v9239_v63  ;;  %v9263_v63 = vld [vmem:[#allocation2 + $0x91] sm:$0xff] }
 0x2e0   : > { %7583 = vmatmul.mubr.msk.f32.gmra.mrb[80].mxu1 %vm279_vm2, %v9241_v15  ;;  %7346 = vmatprep.mubr.msk.f32.mxu0 %vm279_vm2, %v9247_v44  ;;  %10126 = vst [vmem:[#allocation37_spill] sm:$0xff] %v9263_v63  ;;  %v9271_v44 = vld [vmem:[#allocation2 + $0x99] sm:$0xff] }
 0x2e1   : > { %7585 = vmatprep.mubr.msk.f32.mxu1 %vm279_vm2, %v9249_v30  ;;  %10127 = vst [vmem:[#allocation38_spill] sm:$0xff] %v9271_v44 }
 0x2e3   : > { %7347 = vmatmul.mubr.msk.f32.gmra.mrb[68].mxu0 %vm279_vm2, %v9255_v54  ;;  %v9279_v54 = vld [vmem:[#allocation2 + $0xa1] sm:$0xff] }
 0x2e4   : > { %7586 = vmatmul.mubr.msk.f32.gmra.mrb[82].mxu1 %vm279_vm2, %v9257_v45  ;;  %7349 = vmatprep.mubr.msk.f32.mxu0 %vm279_vm2, %v9263_v63  ;;  %10128 = vst [vmem:[#allocation39_spill] sm:$0xff] %v9279_v54  ;;  %v9287_v63 = vld [vmem:[#allocation2 + $0xa9] sm:$0xff] }
 0x2e5   : > { %7588 = vmatprep.mubr.msk.f32.mxu1 %vm279_vm2, %v9265_v46  ;;  %10129 = vst [vmem:[#allocation40_spill] sm:$0xff] %v9287_v63 }
 0x2e7   : > { %7350 = vmatmul.mubr.msk.f32.gmra.mrb[70].mxu0 %vm279_vm2, %v9271_v44  ;;  %v9295_v44 = vld [vmem:[#allocation2 + $0xb1] sm:$0xff] }
 0x2e8   : > { %7589 = vmatmul.mubr.msk.f32.gmra.mrb[84].mxu1 %vm279_vm2, %v9273_v49  ;;  %7352 = vmatprep.mubr.msk.f32.mxu0 %vm279_vm2, %v9279_v54  ;;  %10130 = vst [vmem:[#allocation41_spill] sm:$0xff] %v9295_v44  ;;  %v9303_v54 = vld [vmem:[#allocation2 + $0xb2] sm:$0xff] }
 0x2e9   : > { %7591 = vmatprep.mubr.msk.f32.mxu1 %vm279_vm2, %v9281_v37 }
 0x2eb   : > { %7353 = vmatmul.mubr.msk.f32.gmra.mrb[72].mxu0 %vm279_vm2, %v9287_v63  ;;  %v9309_v63 = vld [vmem:[#allocation2 + $0xba] sm:$0xff] }
 0x2ec   : > { %7592 = vmatmul.mubr.msk.f32.gmra.mrb[86].mxu1 %vm279_vm2, %v9289_v28  ;;  %7355 = vmatprep.mubr.msk.f32.mxu0 %vm279_vm2, %v9295_v44  ;;  %v9315_v44 = vld [vmem:[#allocation2 + $0xc2] sm:$0xff] }
 0x2ed   : > { %7594 = vmatprep.mubr.msk.f32.mxu1 %vm279_vm2, %v9297_v16 }
 0x2ef   : > { %7356 = vmatmul.mubr.msk.f32.gmra.mrb[74].mxu0 %vm279_vm2, %v8963_v32  ;;  %v9321_v32 = vld [vmem:[#allocation2 + $0xca] sm:$0xff] }
 0x2f0   : > { %7595 = vmatmul.mubr.msk.f32.gmra.mrb[88].mxu1 %vm279_vm2, %v9303_v54  ;;  %7358 = vmatprep.mubr.msk.f32.mxu0 %vm279_vm2, %v8965_v35  ;;  %v9327_v35 = vld [vmem:[#allocation2 + $0xd2] sm:$0xff] }
 0x2f1   : > { %7597 = vmatprep.mubr.msk.f32.mxu1 %vm279_vm2, %v9309_v63 }
 0x2f3   : > { %7359 = vmatmul.mubr.msk.f32.gmra.mrb[76].mxu0 %vm279_vm2, %v8981_v43  ;;  %v9333_v43 = vld [vmem:[#allocation2 + $0xda] sm:$0xff] }
 0x2f4   : > { %7598 = vmatmul.mubr.msk.f32.gmra.mrb[50].mxu1 %vm279_vm2, %v9315_v44  ;;  %7361 = vmatprep.mubr.msk.f32.mxu0 %vm279_vm2, %v8999_v51  ;;  %v9339_v51 = vld [vmem:[#allocation2 + $0xe2] sm:$0xff] }
 0x2f5   : > { %7600 = vmatprep.mubr.msk.f32.mxu1 %vm279_vm2, %v9321_v32 }
 0x2f7   : > { %7362 = vmatmul.mubr.msk.f32.gmra.mrb[78].mxu0 %vm279_vm2, %v9008_v6  ;;  %v9345_v6 = vld [vmem:[#allocation2 + $0xea] sm:$0xff] }
 0x2f8   : > { %7601 = vmatmul.mubr.msk.f32.gmra.mrb[52].mxu1 %vm279_vm2, %v9327_v35  ;;  %7364 = vmatprep.mubr.msk.f32.mxu0 %vm279_vm2, %v9017_v19  ;;  %v9351_v19 = vld [vmem:[#allocation2 + $0xf2] sm:$0xff] }
 0x2f9   : > { %7603 = vmatprep.mubr.msk.f32.mxu1 %vm279_vm2, %v9333_v43 }
 0x2fb   : > { %7365 = vmatmul.mubr.msk.f32.gmra.mrb[80].mxu0 %vm279_vm2, %v9026_v4  ;;  %v9357_v4 = vld [vmem:[#allocation2 + $0xfa] sm:$0xff] }
 0x2fc   : > { %7604 = vmatmul.mubr.msk.f32.gmra.mrb[54].mxu1 %vm279_vm2, %v9339_v51  ;;  %7367 = vmatprep.mubr.msk.f32.mxu0 %vm279_vm2, %v9035_v11  ;;  %v9363_v11 = vld [vmem:[#allocation2 + $0x102] sm:$0xff] }
 0x2fd   : > { %7606 = vmatprep.mubr.msk.f32.mxu1 %vm279_vm2, %v9345_v6 }
 0x2ff   : > { %7368 = vmatmul.mubr.msk.f32.gmra.mrb[82].mxu0 %vm279_vm2, %v9044_v57  ;;  %v9369_v57 = vld [vmem:[#allocation2 + $0x10a] sm:$0xff] }
 0x300   : > { %7607 = vmatmul.mubr.msk.f32.gmra.mrb[56].mxu1 %vm279_vm2, %v9351_v19  ;;  %7370 = vmatprep.mubr.msk.f32.mxu0 %vm279_vm2, %v9052_v62  ;;  %v9375_v62 = vld [vmem:[#allocation2 + $0x112] sm:$0xff] }
 0x301   : > { %7609 = vmatprep.mubr.msk.f32.mxu1 %vm279_vm2, %v9357_v4 }
 0x303   : > { %7371 = vmatmul.mubr.msk.f32.gmra.mrb[84].mxu0 %vm279_vm2, %v9062_v20  ;;  %v9381_v20 = vld [vmem:[#allocation2 + $0x11a] sm:$0xff] }
 0x304   : > { %7610 = vmatmul.mubr.msk.f32.gmra.mrb[58].mxu1 %vm279_vm2, %v9363_v11  ;;  %7373 = vmatprep.mubr.msk.f32.mxu0 %vm279_vm2, %v9064_v22  ;;  %10131 = vst [vmem:[#allocation42_spill] sm:$0xff] %v9381_v20  ;;  %v9387_v22 = vld [vmem:[#allocation2 + $0x122] sm:$0xff] }
 0x305   : > { %7612 = vmatprep.mubr.msk.f32.mxu1 %vm279_vm2, %v9369_v57  ;;  %10132 = vst [vmem:[#allocation43_spill] sm:$0xff] %v9387_v22 }
 0x307   : > { %7374 = vmatmul.mubr.msk.f32.gmra.mrb[86].mxu0 %vm279_vm2, %v9080_v38  ;;  %v9393_v38 = vld [vmem:[#allocation2 + $0x12a] sm:$0xff] }
 0x308   : > { %7613 = vmatmul.mubr.msk.f32.gmra.mrb[60].mxu1 %vm279_vm2, %v9375_v62  ;;  %7376 = vmatprep.mubr.msk.f32.mxu0 %vm279_vm2, %v9091_v52  ;;  %10133 = vst [vmem:[#allocation44_spill] sm:$0xff] %v9393_v38  ;;  %v9399_v52 = vld [vmem:[#allocation2 + $0x132] sm:$0xff] }
 0x309   : > { %7615 = vmatprep.mubr.msk.f32.mxu1 %vm279_vm2, %v9381_v20  ;;  %v9405_v20 = vld [vmem:[#allocation2 + $0x13a] sm:$0xff] }
 0x30a   : > { %10134 = vst [vmem:[#allocation45_spill] sm:$0xff] %v9405_v20 }
 0x30b   : > { %7377 = vmatmul.mubr.msk.f32.gmra.mrb[88].mxu0 %vm279_vm2, %v9097_v34  ;;  %v2864_v34 = vld [vmem:[#allocation2 + $0x2] sm:$0xff] }
 0x30c   : > { %7616 = vmatmul.mubr.msk.f32.gmra.mrb[62].mxu1 %vm279_vm2, %v9387_v22  ;;  %7379 = vmatprep.mubr.msk.f32.mxu0 %vm279_vm2, %v9106_v8  ;;  %v2865_v8 = vld [vmem:[#allocation2 + $0xa] sm:$0xff]  ;;  %v9410_v22 = vld [vmem:[#allocation2 + $0x142] sm:$0xff] }
 0x30d   : > { %7618 = vmatprep.mubr.msk.f32.mxu1 %vm279_vm2, %v9393_v38  ;;  %10135 = vst [vmem:[#allocation46_spill] sm:$0xff] %v9410_v22  ;;  %v9415_v38 = vld [vmem:[#allocation2 + $0x14a] sm:$0xff] }
 0x30e   : > { %10136 = vst [vmem:[#allocation47_spill] sm:$0xff] %v9415_v38 }
 0x30f   : > { %7380 = vmatmul.mubr.msk.f32.gmra.mrb[90].mxu0 %vm279_vm2, %v9112_v42  ;;  %v2866_v42 = vld [vmem:[#allocation2 + $0x12] sm:$0xff] }
 0x310   : > { %7619 = vmatmul.mubr.msk.f32.gmra.mrb[64].mxu1 %vm279_vm2, %v9399_v52  ;;  %7384 = vmatprep.mubr.msk.f32.mxu0 %vm279_vm2, %v2864_v34  ;;  %v2867_v34 = vld [vmem:[#allocation2 + $0x1a] sm:$0xff] }
 0x311   : > { %7621 = vmatprep.mubr.msk.f32.mxu1 %vm279_vm2, %v9405_v20  ;;  %v9422_v20 = vld [vmem:[#allocation2 + $0x152] sm:$0xff] }
 0x312   : > { %10137 = vst [vmem:[#allocation48_spill] sm:$0xff] %v9422_v20 }
 0x313   : > { %7385 = vmatmul.mubr.msk.f32.vlgmr.msra.gmra.mrb[52].mxu0 %vm279_vm2, %v2865_v8  ;;  %v2868_v8 = vld [vmem:[#allocation2 + $0x22] sm:$0xff] }
 0x314   : > { %7622 = vmatmul.mubr.msk.f32.gmra.mrb[66].mxu1 %vm279_vm2, %v9410_v22  ;;  %7387 = vmatprep.mubr.msk.f32.mxu0 %vm279_vm2, %v2866_v42  ;;  %v9429_v22 = vld [vmem:[#allocation2 + $0x15a] sm:$0xff]  ;;  %v9434_v42 = vld [vmem:[#allocation2 + $0x162] sm:$0xff] }
 0x315   : > { %7624 = vmatprep.mubr.msk.f32.mxu1 %vm279_vm2, %v9415_v38  ;;  %7445 = vmatpush3.msk.msra.mxu0 %vm2149_vm4, %v9139_v40  ;;  %10138 = vst [vmem:[#allocation49_spill] sm:$0xff] %v9429_v22  ;;  %10139 = vst [vmem:[#allocation50_spill] sm:$0xff] %v9434_v42  ;;  %v8252_v40 = vld [vmem:[%s10018_s3 + $0x10] sm:$0xf] }
 0x316   : > { %7506 = vmatprep.subr.msk.mxu0 %vm2149_vm4, %v8838_v47  ;;  %v9451_v47 = vld [vmem:[%s10018_s3 + $0x20] sm:$0xf]  ;;  %v5149_v38 = vld [vmem:[#allocation2 + $0xc9] sm:$0xff] }
 0x317   : > { %7388 = vmatmul.mubr.msk.f32.gmra.mrb[54].mxu0 %vm279_vm2, %v2867_v34  ;;  %v10150_v34 = vld [vmem:[#allocation29_spill] sm:$0xff] }
 0x318   : > { %7625 = vmatmul.mubr.msk.f32.gmra.mrb[68].mxu1 %vm279_vm2, %v9422_v20  ;;  %7390 = vmatprep.mubr.msk.f32.mxu0 %vm279_vm2, %v2868_v8  ;;  %v3325_v8 = vld [vmem:[#allocation2 + $0x60] sm:$0xff] }
 0x319   : > { %7627 = vmatprep.mubr.msk.f32.mxu1 %vm279_vm2, %v9429_v22  ;;  %v5147_v22 = vld [vmem:[#allocation2 + $0xb9] sm:$0xff]  ;;  %v5148_v20 = vld [vmem:[#allocation2 + $0xc1] sm:$0xff] }
 0x31b   : > { %7391 = vmatmul.mubr.msk.f32.gmra.mrb[56].mxu0 %vm279_vm2, %v9157_v9  ;;  %v4717_v9 = vld [vmem:[#allocation2 + $0x178] sm:$0xff] }
 0x31c   : > { %7628 = vmatmul.mubr.msk.f32.gmra.mrb[70].mxu1 %vm279_vm2, %v9434_v42  ;;  %7393 = vmatprep.mubr.msk.f32.mxu0 %vm279_vm2, %v9165_v59  ;;  %v4719_v59 = vld [vmem:[#allocation2 + $0x188] sm:$0xff] }
 0x31d   : > { %7632 = vmatprep.mubr.msk.f32.mxu1 %vm279_vm2, %v8891_v36  ;;  %v10140_v36 = vld [vmem:[#allocation6_spill] sm:$0xff]  ;;  %v10162_v42 = vld [vmem:[#allocation41_spill] sm:$0xff] }
 0x31f   : > { %7394 = vmatmul.mubr.msk.f32.gmra.mrb[58].mxu0 %vm279_vm2, %v9173_v2  ;;  %v3323_v2 = vld [vmem:[#allocation2 + $0x50] sm:$0xff] }
 0x320   : > { %7633 = vmatmul.mubr.msk.f32.vlgmr.msra.gmra.mrb[72].mxu1 %vm279_vm2, %v8896_v14  ;;  %7396 = vmatprep.mubr.msk.f32.mxu0 %vm279_vm2, %v9188_v18  ;;  %v10141_v14 = vld [vmem:[#allocation9_spill] sm:$0xff] }
 0x321   : > { %7635 = vmatprep.mubr.msk.f32.mxu1 %vm279_vm2, %v8901_v23  ;;  %7693 = vmatpush3.msk.msra.mxu1 %vm2149_vm4, %v9178_v27  ;;  %v10142_v23 = vld [vmem:[#allocation10_spill] sm:$0xff]  ;;  %v3322_v18 = vld [vmem:[#allocation2 + $0x48] sm:$0xff]  ;;  %v3324_v27 = vld [vmem:[#allocation2 + $0x58] sm:$0xff] }
 0x322   : > { %7754 = vmatprep.subr.msk.mxu1 %vm2149_vm4, %v9451_v47 }
 0x323   : > { %7397 = vmatmul.mubr.msk.f32.gmra.mrb[60].mxu0 %vm279_vm2, %v9198_v24  ;;  %v3321_v24 = vld [vmem:[#allocation2 + $0x40] sm:$0xff] }
 0x324   : > { %7636 = vmatmul.mubr.msk.f32.gmra.mrb[74].mxu1 %vm279_vm2, %v8905_v33  ;;  %7399 = vmatprep.mubr.msk.f32.mxu0 %vm279_vm2, %v9207_v29  ;;  %v10143_v33 = vld [vmem:[#allocation13_spill] sm:$0xff] }
 0x325   : > { %7638 = vmatprep.mubr.msk.f32.mxu1 %vm279_vm2, %v8911_v5  ;;  %v10144_v5 = vld [vmem:[#allocation12_spill] sm:$0xff] }
 0x327   : > { %7400 = vmatmul.mubr.msk.f32.gmra.mrb[62].mxu0 %vm279_vm2, %v9215_v26 }
 0x328   : > { %7639 = vmatmul.mubr.msk.f32.gmra.mrb[76].mxu1 %vm279_vm2, %v8916_v10  ;;  %7402 = vmatprep.mubr.msk.f32.mxu0 %vm279_vm2, %v9224_v0  ;;  %v10145_v10 = vld [vmem:[#allocation42_spill] sm:$0xff] }
 0x329   : > { %7641 = vmatprep.mubr.msk.f32.mxu1 %vm279_vm2, %v8921_v13  ;;  %v10146_v13 = vld [vmem:[#allocation16_spill] sm:$0xff] }
 0x32b   : > { %7403 = vmatmul.mubr.msk.f32.gmra.mrb[64].mxu0 %vm279_vm2, %v9232_v48 }
 0x32c   : > { %7642 = vmatmul.mubr.msk.f32.gmra.mrb[78].mxu1 %vm279_vm2, %v8928_v58  ;;  %7405 = vmatprep.mubr.msk.f32.mxu0 %vm279_vm2, %v9241_v15  ;;  %v10147_v58 = vld [vmem:[#allocation43_spill] sm:$0xff] }
 0x32d   : > { %7644 = vmatprep.mubr.msk.f32.mxu1 %vm279_vm2, %v8925_v55  ;;  %v9569_v55 = vld [vmem:[#allocation2 + $0x140] sm:$0xff] }
 0x32f   : > { %7406 = vmatmul.mubr.msk.f32.gmra.mrb[66].mxu0 %vm279_vm2, %v9249_v30 }
 0x330   : > { %7645 = vmatmul.mubr.msk.f32.gmra.mrb[80].mxu1 %vm279_vm2, %v8935_v60  ;;  %7408 = vmatprep.mubr.msk.f32.mxu0 %vm279_vm2, %v9257_v45  ;;  %v9575_v60 = vld [vmem:[#allocation2 + $0x148] sm:$0xff] }
 0x331   : > { %7647 = vmatprep.mubr.msk.f32.mxu1 %vm279_vm2, %v8941_v1  ;;  %v10148_v1 = vld [vmem:[#allocation44_spill] sm:$0xff] }
 0x333   : > { %7409 = vmatmul.mubr.msk.f32.gmra.mrb[68].mxu0 %vm279_vm2, %v9265_v46 }
 0x334   : > { %7648 = vmatmul.mubr.msk.f32.gmra.mrb[82].mxu1 %vm279_vm2, %v8946_v17  ;;  %7411 = vmatprep.mubr.msk.f32.mxu0 %vm279_vm2, %v9273_v49  ;;  %v9581_v17 = vld [vmem:[#allocation2 + $0x150] sm:$0xff] }
 0x335   : > { %7650 = vmatprep.mubr.msk.f32.mxu1 %vm279_vm2, %v8951_v21  ;;  %v9587_v21 = vld [vmem:[#allocation2 + $0x158] sm:$0xff] }
 0x337   : > { %7412 = vmatmul.mubr.msk.f32.gmra.mrb[70].mxu0 %vm279_vm2, %v9281_v37 }
 0x338   : > { %7651 = vmatmul.mubr.msk.f32.gmra.mrb[84].mxu1 %vm279_vm2, %v8955_v3  ;;  %7414 = vmatprep.mubr.msk.f32.mxu0 %vm279_vm2, %v9289_v28  ;;  %v10149_v3 = vld [vmem:[#allocation45_spill] sm:$0xff] }
 0x339   : > { %7653 = vmatprep.mubr.msk.f32.mxu1 %vm279_vm2, %v8961_v31  ;;  %v3318_v31 = vld [vmem:[#allocation2 + $0x28] sm:$0xff] }
 0x33b   : > { %7415 = vmatmul.mubr.msk.f32.gmra.mrb[72].mxu0 %vm279_vm2, %v9297_v16 }
 0x33c   : > { %7654 = vmatmul.mubr.msk.f32.gmra.mrb[86].mxu1 %vm279_vm2, %v8972_v39  ;;  %7417 = vmatprep.mubr.msk.f32.mxu0 %vm279_vm2, %v9303_v54  ;;  %v9593_v39 = vld [vmem:[#allocation2 + $0x160] sm:$0xff] }
 0x33d   : > { %7656 = vmatprep.mubr.msk.f32.mxu1 %vm279_vm2, %v8979_v41  ;;  %v3319_v41 = vld [vmem:[#allocation2 + $0x30] sm:$0xff] }
 0x33f   : > { %7418 = vmatmul.mubr.msk.f32.gmra.mrb[74].mxu0 %vm279_vm2, %v9309_v63 }
 0x340   : > { %7657 = vmatmul.mubr.msk.f32.gmra.mrb[88].mxu1 %vm279_vm2, %v8997_v50  ;;  %7420 = vmatprep.mubr.msk.f32.mxu0 %vm279_vm2, %v9315_v44  ;;  %v3320_v50 = vld [vmem:[#allocation2 + $0x38] sm:$0xff] }
 0x341   : > { %7659 = vmatprep.mubr.msk.f32.mxu1 %vm279_vm2, %v8994_v25  ;;  %v4715_v25 = vld [vmem:[#allocation2 + $0x168] sm:$0xff] }
 0x343   : > { %7421 = vmatmul.mubr.msk.f32.gmra.mrb[76].mxu0 %vm279_vm2, %v9321_v32 }
 0x344   : > { %7660 = vmatmul.mubr.msk.f32.gmra.mrb[50].mxu1 %vm279_vm2, %v9014_v53  ;;  %7423 = vmatprep.mubr.msk.f32.mxu0 %vm279_vm2, %v9327_v35  ;;  %v4716_v53 = vld [vmem:[#allocation2 + $0x170] sm:$0xff] }
 0x345   : > { %7662 = vmatprep.mubr.msk.f32.mxu1 %vm279_vm2, %v9024_v7  ;;  %v4718_v7 = vld [vmem:[#allocation2 + $0x180] sm:$0xff] }
 0x347   : > { %7424 = vmatmul.mubr.msk.f32.gmra.mrb[78].mxu0 %vm279_vm2, %v9333_v43 }
 0x348   : > { %7663 = vmatmul.mubr.msk.f32.gmra.mrb[52].mxu1 %vm279_vm2, %v9033_v12  ;;  %7426 = vmatprep.mubr.msk.f32.mxu0 %vm279_vm2, %v9339_v51 }
 0x349   : > { %7665 = vmatprep.mubr.msk.f32.mxu1 %vm279_vm2, %v9042_v56 }
 0x34b   : > { %7427 = vmatmul.mubr.msk.f32.gmra.mrb[80].mxu0 %vm279_vm2, %v9345_v6 }
 0x34c   : > { %7666 = vmatmul.mubr.msk.f32.gmra.mrb[54].mxu1 %vm279_vm2, %v9050_v61  ;;  %7429 = vmatprep.mubr.msk.f32.mxu0 %vm279_vm2, %v9351_v19 }
 0x34d   : > { %7668 = vmatprep.mubr.msk.f32.mxu1 %vm279_vm2, %v10140_v36 }
 0x34f   : > { %7430 = vmatmul.mubr.msk.f32.gmra.mrb[82].mxu0 %vm279_vm2, %v9357_v4 }
 0x350   : > { %7669 = vmatmul.mubr.msk.f32.gmra.mrb[56].mxu1 %vm279_vm2, %v10141_v14  ;;  %7432 = vmatprep.mubr.msk.f32.mxu0 %vm279_vm2, %v9363_v11 }
 0x351   : > { %7671 = vmatprep.mubr.msk.f32.mxu1 %vm279_vm2, %v10142_v23 }
 0x353   : > { %7433 = vmatmul.mubr.msk.f32.gmra.mrb[84].mxu0 %vm279_vm2, %v9369_v57 }
 0x354   : > { %7672 = vmatmul.mubr.msk.f32.gmra.mrb[58].mxu1 %vm279_vm2, %v10143_v33  ;;  %7435 = vmatprep.mubr.msk.f32.mxu0 %vm279_vm2, %v9375_v62 }
 0x355   : > { %7674 = vmatprep.mubr.msk.f32.mxu1 %vm279_vm2, %v10144_v5 }
 0x357   : > { %7436 = vmatmul.mubr.msk.f32.gmra.mrb[86].mxu0 %vm279_vm2, %v10145_v10 }
 0x358   : > { %7675 = vmatmul.mubr.msk.f32.gmra.mrb[60].mxu1 %vm279_vm2, %v10146_v13  ;;  %7438 = vmatprep.mubr.msk.f32.mxu0 %vm279_vm2, %v10147_v58 }
 0x359   : > { %7677 = vmatprep.mubr.msk.f32.mxu1 %vm279_vm2, %v9569_v55 }
 0x35b   : > { %7439 = vmatmul.mubr.msk.f32.gmra.mrb[88].mxu0 %vm279_vm2, %v10148_v1 }
 0x35c   : > { %7678 = vmatmul.mubr.msk.f32.gmra.mrb[62].mxu1 %vm279_vm2, %v9575_v60  ;;  %7441 = vmatprep.mubr.msk.f32.mxu0 %vm279_vm2, %v9399_v52 }
 0x35d   : > { %7680 = vmatprep.mubr.msk.f32.mxu1 %vm279_vm2, %v9581_v17 }
 0x35f   : > { %7442 = vmatmul.mubr.msk.f32.gmra.mrb[90].mxu0 %vm279_vm2, %v10149_v3  ;;  %v5150_v3 = vld [vmem:[#allocation2 + $0xd1] sm:$0xff] }
 0x360   : > { %7681 = vmatmul.mubr.msk.f32.gmra.mrb[64].mxu1 %vm279_vm2, %v9587_v21  ;;  %7446 = vmatprep.mubr.msk.f32.mxu0 %vm279_vm2, %v3318_v31  ;;  %v10151_v31 = vld [vmem:[#allocation30_spill] sm:$0xff] }
 0x361   : > { %7683 = vmatprep.mubr.msk.f32.mxu1 %vm279_vm2, %v9593_v39 }
 0x363   : > { %7447 = vmatmul.mubr.msk.f32.vlgmr.msra.gmra.mrb[52].mxu0 %vm279_vm2, %v3319_v41  ;;  %v3326_v41 = vld [vmem:[#allocation2 + $0x68] sm:$0xff] }
 0x364   : > { %7684 = vmatmul.mubr.msk.f32.gmra.mrb[66].mxu1 %vm279_vm2, %v4715_v25  ;;  %7449 = vmatprep.mubr.msk.f32.mxu0 %vm279_vm2, %v3320_v50  ;;  %v10152_v25 = vld [vmem:[#allocation31_spill] sm:$0xff]  ;;  %v3327_v50 = vld [vmem:[#allocation2 + $0x70] sm:$0xff] }
 0x365   : > { %7686 = vmatprep.mubr.msk.f32.mxu1 %vm279_vm2, %v4716_v53  ;;  %7507 = vmatpush3.msk.msra.mxu0 %vm2149_vm4, %v8252_v40  ;;  %v10153_v53 = vld [vmem:[#allocation32_spill] sm:$0xff]  ;;  %v10154_v40 = vld [vmem:[#allocation33_spill] sm:$0xff] }
 0x367   : > { %7450 = vmatmul.mubr.msk.f32.gmra.mrb[54].mxu0 %vm279_vm2, %v3321_v24  ;;  %v3329_v24 = vld [vmem:[#allocation2 + $0x80] sm:$0xff] }
 0x368   : > { %7687 = vmatmul.mubr.msk.f32.gmra.mrb[68].mxu1 %vm279_vm2, %v4717_v9  ;;  %7452 = vmatprep.mubr.msk.f32.mxu0 %vm279_vm2, %v3322_v18  ;;  %v10155_v9 = vld [vmem:[#allocation34_spill] sm:$0xff]  ;;  %v3330_v18 = vld [vmem:[#allocation2 + $0x88] sm:$0xff] }
 0x369   : > { %7689 = vmatprep.mubr.msk.f32.mxu1 %vm279_vm2, %v4718_v7  ;;  %v3328_v7 = vld [vmem:[#allocation2 + $0x78] sm:$0xff] }
 0x36b   : > { %7453 = vmatmul.mubr.msk.f32.gmra.mrb[56].mxu0 %vm279_vm2, %v3323_v2  ;;  %v10157_v2 = vld [vmem:[#allocation36_spill] sm:$0xff] }
 0x36c   : > { %7690 = vmatmul.mubr.msk.f32.gmra.mrb[70].mxu1 %vm279_vm2, %v4719_v59  ;;  %7455 = vmatprep.mubr.msk.f32.mxu0 %vm279_vm2, %v3324_v27  ;;  %v3331_v59 = vld [vmem:[#allocation2 + $0x90] sm:$0xff]  ;;  %v3332_v27 = vld [vmem:[#allocation2 + $0x98] sm:$0xff] }
 0x36d   : > { %7694 = vmatprep.mubr.msk.f32.mxu1 %vm279_vm2, %v10150_v34 }
 0x36f   : > { %7456 = vmatmul.mubr.msk.f32.gmra.mrb[58].mxu0 %vm279_vm2, %v3325_v8  ;;  %v10158_v8 = vld [vmem:[#allocation37_spill] sm:$0xff] }
 0x370   : > { %7695 = vmatmul.mubr.msk.f32.vlgmr.msra.gmra.mrb[72].mxu1 %vm279_vm2, %v10151_v31  ;;  %7458 = vmatprep.mubr.msk.f32.mxu0 %vm279_vm2, %v3326_v41  ;;  %v3333_v41 = vld [vmem:[#allocation2 + $0xa0] sm:$0xff] }
 0x371   : > { %7697 = vmatprep.mubr.msk.f32.mxu1 %vm279_vm2, %v10152_v25  ;;  %7755 = vmatpush3.msk.msra.mxu1 %vm2149_vm4, %v9451_v47  ;;  %v10156_v47 = vld [vmem:[#allocation35_spill] sm:$0xff] }
 0x373   : > { %7459 = vmatmul.mubr.msk.f32.gmra.mrb[60].mxu0 %vm279_vm2, %v3327_v50  ;;  %v10159_v50 = vld [vmem:[#allocation38_spill] sm:$0xff] }
 0x374   : > { %7698 = vmatmul.mubr.msk.f32.gmra.mrb[74].mxu1 %vm279_vm2, %v10153_v53  ;;  %7461 = vmatprep.mubr.msk.f32.mxu0 %vm279_vm2, %v3328_v7  ;;  %v3334_v7 = vld [vmem:[#allocation2 + $0xa8] sm:$0xff] }
 0x375   : > { %7700 = vmatprep.mubr.msk.f32.mxu1 %vm279_vm2, %v10154_v40 }
 0x377   : > { %7462 = vmatmul.mubr.msk.f32.gmra.mrb[62].mxu0 %vm279_vm2, %v3329_v24  ;;  %v10160_v24 = vld [vmem:[#allocation39_spill] sm:$0xff] }
 0x378   : > { %7701 = vmatmul.mubr.msk.f32.gmra.mrb[76].mxu1 %vm279_vm2, %v10155_v9  ;;  %7464 = vmatprep.mubr.msk.f32.mxu0 %vm279_vm2, %v3330_v18  ;;  %v3335_v18 = vld [vmem:[#allocation2 + $0xb0] sm:$0xff] }
 0x379   : > { %7703 = vmatprep.mubr.msk.f32.mxu1 %vm279_vm2, %v10156_v47 }
 0x37b   : > { %7465 = vmatmul.mubr.msk.f32.gmra.mrb[64].mxu0 %vm279_vm2, %v3331_v59  ;;  %v10161_v59 = vld [vmem:[#allocation40_spill] sm:$0xff] }
 0x37c   : > { %7704 = vmatmul.mubr.msk.f32.gmra.mrb[78].mxu1 %vm279_vm2, %v10157_v2  ;;  %7467 = vmatprep.mubr.msk.f32.mxu0 %vm279_vm2, %v3332_v27  ;;  %v3336_v27 = vld [vmem:[#allocation2 + $0xb8] sm:$0xff] }
 0x37d   : > { %7706 = vmatprep.mubr.msk.f32.mxu1 %vm279_vm2, %v10158_v8 }
 0x37f   : > { %7468 = vmatmul.mubr.msk.f32.gmra.mrb[66].mxu0 %vm279_vm2, %v3333_v41  ;;  %v3337_v41 = vld [vmem:[#allocation2 + $0xc0] sm:$0xff] }
 0x380   : > { %7707 = vmatmul.mubr.msk.f32.gmra.mrb[80].mxu1 %vm279_vm2, %v10159_v50  ;;  %7470 = vmatprep.mubr.msk.f32.mxu0 %vm279_vm2, %v3334_v7  ;;  %v3338_v7 = vld [vmem:[#allocation2 + $0xc8] sm:$0xff] }
 0x381   : > { %7709 = vmatprep.mubr.msk.f32.mxu1 %vm279_vm2, %v10160_v24 }
 0x383   : > { %7471 = vmatmul.mubr.msk.f32.gmra.mrb[68].mxu0 %vm279_vm2, %v3335_v18  ;;  %v3339_v18 = vld [vmem:[#allocation2 + $0xd0] sm:$0xff] }
 0x384   : > { %7710 = vmatmul.mubr.msk.f32.gmra.mrb[82].mxu1 %vm279_vm2, %v10161_v59  ;;  %7473 = vmatprep.mubr.msk.f32.mxu0 %vm279_vm2, %v3336_v27  ;;  %v3340_v27 = vld [vmem:[#allocation2 + $0xd8] sm:$0xff] }
 0x385   : > { %7712 = vmatprep.mubr.msk.f32.mxu1 %vm279_vm2, %v10162_v42 }
 0x387   : > { %7474 = vmatmul.mubr.msk.f32.gmra.mrb[70].mxu0 %vm279_vm2, %v3337_v41  ;;  %v3341_v41 = vld [vmem:[#allocation2 + $0xe0] sm:$0xff] }
 0x388   : > { %7713 = vmatmul.mubr.msk.f32.gmra.mrb[84].mxu1 %vm279_vm2, %v5147_v22  ;;  %7476 = vmatprep.mubr.msk.f32.mxu0 %vm279_vm2, %v3338_v7  ;;  %v5151_v22 = vld [vmem:[#allocation2 + $0xd9] sm:$0xff]  ;;  %v3342_v7 = vld [vmem:[#allocation2 + $0xe8] sm:$0xff] }
 0x389   : > { %7715 = vmatprep.mubr.msk.f32.mxu1 %vm279_vm2, %v5148_v20  ;;  %v5152_v20 = vld [vmem:[#allocation2 + $0xe1] sm:$0xff] }
 0x38b   : > { %7477 = vmatmul.mubr.msk.f32.gmra.mrb[72].mxu0 %vm279_vm2, %v3339_v18  ;;  %v3343_v18 = vld [vmem:[#allocation2 + $0xf0] sm:$0xff] }
 0x38c   : > { %7716 = vmatmul.mubr.msk.f32.gmra.mrb[86].mxu1 %vm279_vm2, %v5149_v38  ;;  %7479 = vmatprep.mubr.msk.f32.mxu0 %vm279_vm2, %v3340_v27  ;;  %v5153_v38 = vld [vmem:[#allocation2 + $0xe9] sm:$0xff]  ;;  %v10164_v27 = vld [vmem:[#allocation4_spill] sm:$0xff] }
 0x38d   : > { %7718 = vmatprep.mubr.msk.f32.mxu1 %vm279_vm2, %v5150_v3  ;;  %v10163_v3 = vld [vmem:[#allocation3_spill] sm:$0xff] }
 0x38f   : > { %7480 = vmatmul.mubr.msk.f32.gmra.mrb[74].mxu0 %vm279_vm2, %v3341_v41  ;;  %v10165_v41 = vld [vmem:[#allocation5_spill] sm:$0xff] }
 0x390   : > { %7719 = vmatmul.mubr.msk.f32.gmra.mrb[88].mxu1 %vm279_vm2, %v5151_v22  ;;  %7482 = vmatprep.mubr.msk.f32.mxu0 %vm279_vm2, %v3342_v7  ;;  %v10166_v22 = vld [vmem:[#allocation7_spill] sm:$0xff] }
 0x391   : > { %7721 = vmatprep.mubr.msk.f32.mxu1 %vm279_vm2, %v5152_v20  ;;  %v10178_v7 = vld [vmem:[#allocation23_spill] sm:$0xff]  ;;  %v10179_v20 = vld [vmem:[#allocation25_spill] sm:$0xff] }
 0x393   : > { %7483 = vmatmul.mubr.msk.f32.gmra.mrb[76].mxu0 %vm279_vm2, %v3343_v18  ;;  %v10180_v18 = vld [vmem:[#allocation26_spill] sm:$0xff] }
 0x394   : > { %7722 = vmatmul.mubr.msk.f32.gmra.mrb[50].mxu1 %vm279_vm2, %v5153_v38  ;;  %7485 = vmatprep.mubr.msk.f32.mxu0 %vm279_vm2, %v9033_v12  ;;  %v10167_v12 = vld [vmem:[#allocation8_spill] sm:$0xff]  ;;  %v10181_v38 = vld [vmem:[#allocation27_spill] sm:$0xff] }
 0x395   : > { %7724 = vmatprep.mubr.msk.f32.mxu1 %vm279_vm2, %v10163_v3  ;;  %v5172_v3 = vld [vmem:[#allocation2 + $0x181] sm:$0xff] }
 0x397   : > { %7486 = vmatmul.mubr.msk.f32.gmra.mrb[78].mxu0 %vm279_vm2, %v9042_v56  ;;  %v10168_v56 = vld [vmem:[#allocation11_spill] sm:$0xff] }
 0x398   : > { %7725 = vmatmul.mubr.msk.f32.gmra.mrb[52].mxu1 %vm279_vm2, %v10164_v27  ;;  %7488 = vmatprep.mubr.msk.f32.mxu0 %vm279_vm2, %v9050_v61  ;;  %v10169_v61 = vld [vmem:[#allocation14_spill] sm:$0xff]  ;;  %v10182_v27 = vld [vmem:[#allocation28_spill] sm:$0xff] }
 0x399   : > { %7727 = vmatprep.mubr.msk.f32.mxu1 %vm279_vm2, %v10165_v41  ;;  %v5173_v41 = vld [vmem:[#allocation2 + $0x189] sm:$0xff] }
 0x39b   : > { %7489 = vmatmul.mubr.msk.f32.gmra.mrb[80].mxu0 %vm279_vm2, %v10140_v36  ;;  %v10170_v36 = vld [vmem:[#allocation15_spill] sm:$0xff] }
 0x39c   : > { %7728 = vmatmul.mubr.msk.f32.gmra.mrb[54].mxu1 %vm279_vm2, %v10166_v22  ;;  %7491 = vmatprep.mubr.msk.f32.mxu0 %vm279_vm2, %v10141_v14  ;;  %v10171_v14 = vld [vmem:[#allocation17_spill] sm:$0xff] }
 0x39d   : > { %7730 = vmatprep.mubr.msk.f32.mxu1 %vm279_vm2, %v10167_v12 }
 0x39f   : > { %7492 = vmatmul.mubr.msk.f32.gmra.mrb[82].mxu0 %vm279_vm2, %v10142_v23  ;;  %v10172_v23 = vld [vmem:[#allocation18_spill] sm:$0xff] }
 0x3a0   : > { %7731 = vmatmul.mubr.msk.f32.gmra.mrb[56].mxu1 %vm279_vm2, %v10168_v56  ;;  %7494 = vmatprep.mubr.msk.f32.mxu0 %vm279_vm2, %v10143_v33  ;;  %v10173_v33 = vld [vmem:[#allocation19_spill] sm:$0xff] }
 0x3a1   : > { %7733 = vmatprep.mubr.msk.f32.mxu1 %vm279_vm2, %v10169_v61 }
 0x3a3   : > { %7495 = vmatmul.mubr.msk.f32.gmra.mrb[84].mxu0 %vm279_vm2, %v10144_v5  ;;  %v10174_v5 = vld [vmem:[#allocation20_spill] sm:$0xff] }
 0x3a4   : > { %7734 = vmatmul.mubr.msk.f32.gmra.mrb[58].mxu1 %vm279_vm2, %v10170_v36  ;;  %7497 = vmatprep.mubr.msk.f32.mxu0 %vm279_vm2, %v10146_v13  ;;  %v10175_v13 = vld [vmem:[#allocation21_spill] sm:$0xff] }
 0x3a5   : > { %7736 = vmatprep.mubr.msk.f32.mxu1 %vm279_vm2, %v10171_v14 }
 0x3a7   : > { %7498 = vmatmul.mubr.msk.f32.gmra.mrb[86].mxu0 %vm279_vm2, %v9569_v55  ;;  %v10176_v55 = vld [vmem:[#allocation22_spill] sm:$0xff] }
 0x3a8   : > { %7737 = vmatmul.mubr.msk.f32.gmra.mrb[60].mxu1 %vm279_vm2, %v10172_v23  ;;  %7500 = vmatprep.mubr.msk.f32.mxu0 %vm279_vm2, %v9575_v60  ;;  %v10177_v60 = vld [vmem:[#allocation24_spill] sm:$0xff] }
 0x3a9   : > { %7739 = vmatprep.mubr.msk.f32.mxu1 %vm279_vm2, %v10173_v33 }
 0x3ab   : > { %7501 = vmatmul.mubr.msk.f32.gmra.mrb[88].mxu0 %vm279_vm2, %v9581_v17  ;;  %v5169_v17 = vld [vmem:[#allocation2 + $0x169] sm:$0xff] }
 0x3ac   : > { %7740 = vmatmul.mubr.msk.f32.gmra.mrb[62].mxu1 %vm279_vm2, %v10174_v5  ;;  %7503 = vmatprep.mubr.msk.f32.mxu0 %vm279_vm2, %v9587_v21  ;;  %v5170_v21 = vld [vmem:[#allocation2 + $0x171] sm:$0xff] }
 0x3ad   : > { %7742 = vmatprep.mubr.msk.f32.mxu1 %vm279_vm2, %v10175_v13 }
 0x3af   : > { %7504 = vmatmul.mubr.msk.f32.gmra.mrb[90].mxu0 %vm279_vm2, %v9593_v39  ;;  %v5171_v39 = vld [vmem:[#allocation2 + $0x179] sm:$0xff] }
 0x3b0   : > { %7743 = vmatmul.mubr.msk.f32.gmra.mrb[64].mxu1 %vm279_vm2, %v10176_v55  ;;  %7508 = vmatprep.mubr.msk.f32.mxu0 %vm279_vm2, %v10177_v60 }
 0x3b1   : > { %7745 = vmatprep.mubr.msk.f32.mxu1 %vm279_vm2, %v10178_v7 }
 0x3b3   : > { %7509 = vmatmul.mubr.msk.f32.vlgmr.msra.gmra.mrb[52].mxu0 %vm279_vm2, %v10179_v20 }
 0x3b4   : > { %7746 = vmatmul.mubr.msk.f32.gmra.mrb[66].mxu1 %vm279_vm2, %v5169_v17  ;;  %7511 = vmatprep.mubr.msk.f32.mxu0 %vm279_vm2, %v10180_v18 }
 0x3b5   : > { %7748 = vmatprep.mubr.msk.f32.mxu1 %vm279_vm2, %v5170_v21 }
 0x3b7   : > { %7512 = vmatmul.mubr.msk.f32.gmra.mrb[54].mxu0 %vm279_vm2, %v10181_v38 }
 0x3b8   : > { %7749 = vmatmul.mubr.msk.f32.gmra.mrb[68].mxu1 %vm279_vm2, %v5171_v39  ;;  %7514 = vmatprep.mubr.msk.f32.mxu0 %vm279_vm2, %v10182_v27 }
 0x3b9   : > { %7751 = vmatprep.mubr.msk.f32.mxu1 %vm279_vm2, %v5172_v3 }
 0x3bb   : > { %7515 = vmatmul.mubr.msk.f32.gmra.mrb[56].mxu0 %vm279_vm2, %v10150_v34 }
 0x3bc   : > { %7752 = vmatmul.mubr.msk.f32.gmra.mrb[70].mxu1 %vm279_vm2, %v5173_v41  ;;  %7517 = vmatprep.mubr.msk.f32.mxu0 %vm279_vm2, %v10151_v31 }
 0x3bd   : > { %7756 = vmatprep.mubr.msk.f32.mxu1 %vm279_vm2, %v9207_v29 }
 0x3bf   : > { %7518 = vmatmul.mubr.msk.f32.gmra.mrb[58].mxu0 %vm279_vm2, %v10152_v25 }
 0x3c0   : > { %7757 = vmatmul.mubr.msk.f32.vlgmr.msra.gmra.mrb[72].mxu1 %vm279_vm2, %v9215_v26  ;;  %7520 = vmatprep.mubr.msk.f32.mxu0 %vm279_vm2, %v10153_v53 }
 0x3c1   : > { %7759 = vmatprep.mubr.msk.f32.mxu1 %vm279_vm2, %v9224_v0  ;;  %v5627_v0 = vld [vmem:[#allocation2 + $0x18a] sm:$0xff] }
 0x3c3   : > { %7521 = vmatmul.mubr.msk.f32.gmra.mrb[60].mxu0 %vm279_vm2, %v10154_v40 }
 0x3c4   : > { %7760 = vmatmul.mubr.msk.f32.gmra.mrb[74].mxu1 %vm279_vm2, %v9232_v48  ;;  %7523 = vmatprep.mubr.msk.f32.mxu0 %vm279_vm2, %v10155_v9 }
 0x3c5   : > { %7762 = vmatprep.mubr.msk.f32.mxu1 %vm279_vm2, %v9241_v15 }
 0x3c7   : > { %7524 = vmatmul.mubr.msk.f32.gmra.mrb[62].mxu0 %vm279_vm2, %v10156_v47 }
 0x3c8   : > { %7763 = vmatmul.mubr.msk.f32.gmra.mrb[76].mxu1 %vm279_vm2, %v9249_v30  ;;  %7526 = vmatprep.mubr.msk.f32.mxu0 %vm279_vm2, %v10157_v2 }
 0x3c9   : > { %7765 = vmatprep.mubr.msk.f32.mxu1 %vm279_vm2, %v9257_v45 }
 0x3cb   : > { %7527 = vmatmul.mubr.msk.f32.gmra.mrb[64].mxu0 %vm279_vm2, %v10158_v8 }
 0x3cc   : > { %7766 = vmatmul.mubr.msk.f32.gmra.mrb[78].mxu1 %vm279_vm2, %v9265_v46  ;;  %7529 = vmatprep.mubr.msk.f32.mxu0 %vm279_vm2, %v10159_v50  ;;  %v5623_v46 = vld [vmem:[#allocation2 + $0x16a] sm:$0xff]  ;;  %v9880_v50 = vld [vmem:[%s10019_s4] ss:$0 sm:$0xff] }
 0x3cd   : > { %7768 = vmatprep.mubr.msk.f32.mxu1 %vm279_vm2, %v9273_v49  ;;  %v5624_v49 = vld [vmem:[#allocation2 + $0x172] sm:$0xff] }
 0x3cf   : > { %7530 = vmatmul.mubr.msk.f32.gmra.mrb[66].mxu0 %vm279_vm2, %v10160_v24 }
 0x3d0   : > { %7769 = vmatmul.mubr.msk.f32.gmra.mrb[80].mxu1 %vm279_vm2, %v9281_v37  ;;  %7532 = vmatprep.mubr.msk.f32.mxu0 %vm279_vm2, %v10161_v59  ;;  %v10188_v37 = vld [vmem:[#allocation50_spill] sm:$0xff] }
 0x3d1   : > { %7771 = vmatprep.mubr.msk.f32.mxu1 %vm279_vm2, %v9289_v28  ;;  %v10187_v28 = vld [vmem:[#allocation49_spill] sm:$0xff] }
 0x3d3   : > { %7533 = vmatmul.mubr.msk.f32.gmra.mrb[68].mxu0 %vm279_vm2, %v10162_v42 }
 0x3d4   : > { %7772 = vmatmul.mubr.msk.f32.gmra.mrb[82].mxu1 %vm279_vm2, %v9297_v16  ;;  %v10183_v16 = vld [vmem:[#allocation45_spill] sm:$0xff] }
 0x3d5   : > { %7774 = vmatprep.mubr.msk.f32.mxu1 %vm279_vm2, %v9303_v54 }
 0x3d8   : > { %7775 = vmatmul.mubr.msk.f32.gmra.mrb[84].mxu1 %vm279_vm2, %v9309_v63 }
 0x3d9   : > { %7777 = vmatprep.mubr.msk.f32.mxu1 %vm279_vm2, %v9315_v44  ;;  %v5626_v44 = vld [vmem:[#allocation2 + $0x182] sm:$0xff] }
 0x3dc   : > { %7778 = vmatmul.mubr.msk.f32.gmra.mrb[86].mxu1 %vm279_vm2, %v9321_v32 }
 0x3dd   : > { %7780 = vmatprep.mubr.msk.f32.mxu1 %vm279_vm2, %v9327_v35 }
 0x3e0   : > { %7781 = vmatmul.mubr.msk.f32.gmra.mrb[88].mxu1 %vm279_vm2, %v9333_v43 }
 0x3e1   : > { %7783 = vmatprep.mubr.msk.f32.mxu1 %vm279_vm2, %v9339_v51 }
 0x3e4   : > { %7784 = vmatmul.mubr.msk.f32.gmra.mrb[50].mxu1 %vm279_vm2, %v9345_v6 }
 0x3e5   : > { %7786 = vmatprep.mubr.msk.f32.mxu1 %vm279_vm2, %v9351_v19 }
 0x3e8   : > { %7787 = vmatmul.mubr.msk.f32.gmra.mrb[52].mxu1 %vm279_vm2, %v9357_v4 }
 0x3e9   : > { %7789 = vmatprep.mubr.msk.f32.mxu1 %vm279_vm2, %v9363_v11  ;;  %v10184_v11 = vld [vmem:[#allocation46_spill] sm:$0xff] }
 0x3ec   : > { %7790 = vmatmul.mubr.msk.f32.gmra.mrb[54].mxu1 %vm279_vm2, %v9369_v57  ;;  %v10185_v57 = vld [vmem:[#allocation47_spill] sm:$0xff] }
 0x3ed   : > { %7792 = vmatprep.mubr.msk.f32.mxu1 %vm279_vm2, %v9375_v62  ;;  %v10186_v62 = vld [vmem:[#allocation48_spill] sm:$0xff] }
 0x3f0   : > { %7793 = vmatmul.mubr.msk.f32.gmra.mrb[56].mxu1 %vm279_vm2, %v10145_v10 }
 0x3f1   : > { %7795 = vmatprep.mubr.msk.f32.mxu1 %vm279_vm2, %v10147_v58 }
 0x3f4   : > { %7796 = vmatmul.mubr.msk.f32.gmra.mrb[58].mxu1 %vm279_vm2, %v10148_v1 }
 0x3f5   : > { %7798 = vmatprep.mubr.msk.f32.mxu1 %vm279_vm2, %v9399_v52  ;;  %v5625_v52 = vld [vmem:[#allocation2 + $0x17a] sm:$0xff] }
 0x3f8   : > { %7799 = vmatmul.mubr.msk.f32.gmra.mrb[60].mxu1 %vm279_vm2, %v10183_v16 }
 0x3f9   : > { %7801 = vmatprep.mubr.msk.f32.mxu1 %vm279_vm2, %v10184_v11 }
 0x3fc   : > { %7802 = vmatmul.mubr.msk.f32.gmra.mrb[62].mxu1 %vm279_vm2, %v10185_v57 }
 0x3fd   : > { %7804 = vmatprep.mubr.msk.f32.mxu1 %vm279_vm2, %v10186_v62 }
 0x400   : > { %7805 = vmatmul.mubr.msk.f32.gmra.mrb[64].mxu1 %vm279_vm2, %v10187_v28 }
 0x401   : > { %7807 = vmatprep.mubr.msk.f32.mxu1 %vm279_vm2, %v10188_v37 }
 0x404   : > { %7808 = vmatmul.mubr.msk.f32.gmra.mrb[66].mxu1 %vm279_vm2, %v5623_v46 }
 0x405   : > { %7810 = vmatprep.mubr.msk.f32.mxu1 %vm279_vm2, %v5624_v49 }
 0x408   : > { %7811 = vmatmul.mubr.msk.f32.gmra.mrb[68].mxu1 %vm279_vm2, %v5625_v52 }
 0x409   : > { %7813 = vmatprep.mubr.msk.f32.mxu1 %vm279_vm2, %v5626_v44 }
 0x40c   : > { %7814 = vmatmul.mubr.msk.f32.gmra.mrb[70].mxu1 %vm279_vm2, %v5627_v0 }
 0x45a   : > { %v7475_v15 = vpop.f32.mrb[70].mxu0 }
 0x45b   : > { %v9841_v26 = vpop.f32.mrb[71].mxu0 }
 0x45e   : > { %v9843_v48 = vpop.f32.mrb[72].mxu0 }
 0x45f   : > { %v9845_v30 = vpop.f32.mrb[73].mxu0 }
 0x462   : > { %v9847_v63 = vpop.f32.mrb[74].mxu0 }
 0x463   : > { %v9849_v29 = vpop.f32.mrb[75].mxu0 }
 0x466   : > { %v9851_v54 = vpop.f32.mrb[76].mxu0 }
 0x467   : > { %v3665_v45 = vpop.f32.mrb[77].mxu0 }
 0x46a   : > { %v9853_v32 = vpop.f32.mrb[78].mxu0 }
 0x46b   : > { %v9855_v35 = vpop.f32.mrb[79].mxu0 }
 0x46e   : > { %v7490_v43 = vpop.f32.mrb[80].mxu0 }
 0x46f   : > { %v9857_v51 = vpop.f32.mrb[81].mxu0 }
 0x472   : > { %v9859_v6 = vpop.f32.mrb[82].mxu0 }
 0x473   : > { %v9861_v19 = vpop.f32.mrb[83].mxu0 }
 0x476   : > { %v9863_v4 = vpop.f32.mrb[84].mxu0 }
 0x477   : > { %v9865_v42 = vpop.f32.mrb[85].mxu0 }
 0x47a   : > { %v9867_v10 = vpop.f32.mrb[86].mxu0 }
 0x47b   : > { %v3713_v58 = vpop.f32.mrb[87].mxu0 }
 0x47e   : > { %v9869_v1 = vpop.f32.mrb[88].mxu0 }
 0x47f   : > { %v9871_v34 = vpop.f32.mrb[89].mxu0 }
 0x482   : > { %v7505_v31 = vpop.f32.mrb[90].mxu0 }
 0x483   : > { %v9874_v25 = vpop.f32.mrb[91].mxu0 }
 0x486   : > { %v7510_v53 = vpop.f32.mrb[52].mxu0 }
 0x487   : > { %v4003_v40 = vpop.f32.mrb[53].mxu0  ;;  %v7848_v24 = vadd.f32 %v7510_v53, %v9880_v50 }
 0x488   : > { %v7850_v59 = vadd.f32 %v9880_v50, %v4003_v40 }
 0x48a   : > { %v7513_v9 = vpop.f32.mrb[54].mxu0 }
 0x48b   : > { %v4013_v47 = vpop.f32.mrb[55].mxu0  ;;  %v7852_v23 = vadd.f32 %v7513_v9, %v9880_v50 }
 0x48c   : > { %v7854_v33 = vadd.f32 %v9880_v50, %v4013_v47 }
 0x48e   : > { %v7516_v2 = vpop.f32.mrb[56].mxu0 }
 0x48f   : > { %v4023_v8 = vpop.f32.mrb[57].mxu0  ;;  %v7856_v20 = vadd.f32 %v7516_v2, %v9880_v50 }
 0x492   : > { %v7519_v22 = vpop.f32.mrb[58].mxu0 }
 0x493   : > { %v7758_v12 = vpop.f32.mrb[72].mxu1  ;;  %v4032_v61 = vpop.f32.mrb[59].mxu0  ;;  %v7858_v27 = vadd.f32 %v7519_v22, %v9880_v50 }
 0x494   : > { %v7849_v56 = vadd.f32 %v7848_v24, %v7758_v12  ;;  %v5819_v36 = vpop.f32.mrb[73].mxu1  ;;  %v7860_v41 = vadd.f32 %v9880_v50, %v4032_v61 }
 0x495   : > { %v7851_v14 = vadd.f32 %v7850_v59, %v5819_v36 }
 0x496   : > { %6043 = vst.msk [vmem:[%s9886_s9 + $0x8] sm:$0xff] %vm284_vm0, %v7849_v56  ;;  %v7522_v5 = vpop.f32.mrb[60].mxu0 }
 0x497   : > { %6042 = vst.msk [vmem:[%s9886_s9] sm:$0xff] %vm284_vm0, %v7851_v14  ;;  %v7761_v13 = vpop.f32.mrb[74].mxu1  ;;  %v4042_v60 = vpop.f32.mrb[61].mxu0 }
 0x498   : > { %v7853_v55 = vadd.f32 %v7852_v23, %v7761_v13  ;;  %v5829_v7 = vpop.f32.mrb[75].mxu1  ;;  %v7862_v46 = vadd.f32 %v9880_v50, %v4042_v60 }
 0x499   : > { %v7855_v17 = vadd.f32 %v7854_v33, %v5829_v7  ;;  %v7878_v7 = vadd.f32 %v9880_v50, %v9841_v26  ;;  %v7884_v26 = vadd.f32 %v9847_v63, %v9880_v50 }
 0x49a   : > { %6045 = vst.msk [vmem:[%s9886_s9 + $0x18] sm:$0xff] %vm284_vm0, %v7853_v55  ;;  %v7525_v21 = vpop.f32.mrb[62].mxu0 }
 0x49b   : > { %6044 = vst.msk [vmem:[%s9886_s9 + $0x10] sm:$0xff] %vm284_vm0, %v7855_v17  ;;  %v7764_v18 = vpop.f32.mrb[76].mxu1  ;;  %v4051_v38 = vpop.f32.mrb[63].mxu0  ;;  %v7864_v45 = vadd.f32 %v7525_v21, %v9880_v50 }
 0x49c   : > { %v7857_v39 = vadd.f32 %v7856_v20, %v7764_v18  ;;  %v5839_v3 = vpop.f32.mrb[77].mxu1  ;;  %v7866_v43 = vadd.f32 %v9880_v50, %v4051_v38  ;;  %v7880_v18 = vadd.f32 %v9843_v48, %v9880_v50  ;;  %v7886_v48 = vadd.f32 %v9880_v50, %v9849_v29 }
 0x49d   : > { %v7890_v29 = vadd.f32 %v9853_v32, %v9880_v50 }
 0x49e   : > { %6046 = vst.msk [vmem:[%s9886_s9 + $0x20] sm:$0xff] %vm284_vm0, %v7857_v39  ;;  %v7528_v16 = vpop.f32.mrb[64].mxu0  ;;  %v7882_v39 = vadd.f32 %v9880_v50, %v9845_v30 }
 0x49f   : > { %v7767_v11 = vpop.f32.mrb[78].mxu1  ;;  %v4061_v62 = vpop.f32.mrb[65].mxu0  ;;  %v7868_v2 = vadd.f32 %v7528_v16, %v9880_v50 }
 0x4a0   : > { %v7859_v57 = vadd.f32 %v7858_v27, %v7767_v11  ;;  %v5848_v28 = vpop.f32.mrb[79].mxu1  ;;  %v7870_v8 = vadd.f32 %v9880_v50, %v4061_v62  ;;  %v7888_v62 = vadd.f32 %v9851_v54, %v9880_v50 }
 0x4a1   : > { %v7861_v37 = vadd.f32 %v7860_v41, %v5848_v28 }
 0x4a2   : > { %6048 = vst.msk [vmem:[%s9886_s9 + $0x30] sm:$0xff] %vm284_vm0, %v7859_v57  ;;  %v7531_v49 = vpop.f32.mrb[66].mxu0 }
 0x4a3   : > { %6047 = vst.msk [vmem:[%s9886_s9 + $0x28] sm:$0xff] %vm284_vm0, %v7861_v37  ;;  %v7770_v52 = vpop.f32.mrb[80].mxu1  ;;  %v4071_v44 = vpop.f32.mrb[67].mxu0  ;;  %v7872_v56 = vadd.f32 %v7531_v49, %v9880_v50 }
 0x4a4   : > { %v5858_v0 = vpop.f32.mrb[81].mxu1 }
 0x4a5   : > { %v7863_v15 = vadd.f32 %v7862_v46, %v5858_v0  ;;  %v7892_v46 = vadd.f32 %v9880_v50, %v9855_v35  ;;  %v7894_v0 = vadd.f32 %v9880_v50, %v9857_v51  ;;  %v7898_v35 = vadd.f32 %v9880_v50, %v9861_v19 }
 0x4a6   : > { %v7534_v58 = vpop.f32.mrb[68].mxu0  ;;  %v7900_v51 = vadd.f32 %v9863_v4, %v9880_v50 }
 0x4a7   : > { %6049 = vst.msk [vmem:[%s9886_s9 + $0x38] sm:$0xff] %vm284_vm0, %v7863_v15  ;;  %v7773_v31 = vpop.f32.mrb[82].mxu1  ;;  %v4080_v40 = vpop.f32.mrb[69].mxu0  ;;  %v7874_v23 = vadd.f32 %v7534_v58, %v9880_v50 }
 0x4a8   : > { %v7865_v53 = vadd.f32 %v7864_v45, %v7773_v31  ;;  %v5867_v9 = vpop.f32.mrb[83].mxu1  ;;  %v7876_v33 = vadd.f32 %v9880_v50, %v4080_v40 }
 0x4a9   : > { %v7867_v47 = vadd.f32 %v7866_v43, %v5867_v9  ;;  %v7896_v43 = vadd.f32 %v9859_v6, %v9880_v50  ;;  %v7902_v6 = vadd.f32 %v9880_v50, %v9865_v42  ;;  %v7906_v42 = vadd.f32 %v9869_v1, %v9880_v50 }
 0x4aa   : > { %6051 = vst.msk [vmem:[%s9886_s9 + $0x48] sm:$0xff] %vm284_vm0, %v7865_v53 }
 0x4ab   : > { %6050 = vst.msk [vmem:[%s9886_s9 + $0x40] sm:$0xff] %vm284_vm0, %v7867_v47  ;;  %v7776_v24 = vpop.f32.mrb[84].mxu1 }
 0x4ac   : > { %v7869_v59 = vadd.f32 %v7868_v2, %v7776_v24  ;;  %v5877_v22 = vpop.f32.mrb[85].mxu1 }
 0x4ad   : > { %v7871_v12 = vadd.f32 %v7870_v8, %v5877_v22  ;;  %v7904_v8 = vadd.f32 %v9867_v10, %v9880_v50  ;;  %v7908_v22 = vadd.f32 %v9880_v50, %v9871_v34 }
 0x4ae   : > { %6053 = vst.msk [vmem:[%s9886_s9 + $0x58] sm:$0xff] %vm284_vm0, %v7869_v59 }
 0x4af   : > { %6052 = vst.msk [vmem:[%s9886_s9 + $0x50] sm:$0xff] %vm284_vm0, %v7871_v12  ;;  %v7779_v61 = vpop.f32.mrb[86].mxu1 }
 0x4b0   : > { %v7873_v36 = vadd.f32 %v7872_v56, %v7779_v61  ;;  %v5887_v14 = vpop.f32.mrb[87].mxu1 }
 0x4b2   : > { %6054 = vst.msk [vmem:[%s9886_s9 + $0x60] sm:$0xff] %vm284_vm0, %v7873_v36  ;;  %v7910_v36 = vadd.f32 %v9880_v50, %v9874_v25 }
 0x4b3   : > { %v7782_v5 = vpop.f32.mrb[88].mxu1 }
 0x4b4   : > { %v7875_v13 = vadd.f32 %v7874_v23, %v7782_v5  ;;  %v5896_v55 = vpop.f32.mrb[89].mxu1 }
 0x4b5   : > { %v7877_v60 = vadd.f32 %v7876_v33, %v5896_v55 }
 0x4b6   : > { %6056 = vst.msk [vmem:[%s9886_s9 + $0x70] sm:$0xff] %vm284_vm0, %v7875_v13 }
 0x4b7   : > { %6055 = vst.msk [vmem:[%s9886_s9 + $0x68] sm:$0xff] %vm284_vm0, %v7877_v60  ;;  %v7785_v17 = vpop.f32.mrb[50].mxu1 }
 0x4b8   : > { %v5906_v20 = vpop.f32.mrb[51].mxu1 }
 0x4b9   : > { %v7879_v21 = vadd.f32 %v7878_v7, %v5906_v20 }
 0x4bb   : > { %6057 = vst.msk [vmem:[%s9886_s9 + $0x78] sm:$0xff] %vm284_vm0, %v7879_v21  ;;  %v7788_v38 = vpop.f32.mrb[52].mxu1 }
 0x4bc   : > { %v7881_v3 = vadd.f32 %v7880_v18, %v7788_v38  ;;  %v5915_v27 = vpop.f32.mrb[53].mxu1 }
 0x4bd   : > { %v7883_v41 = vadd.f32 %v7882_v39, %v5915_v27 }
 0x4be   : > { %6059 = vst.msk [vmem:[%s9886_s9 + $0x88] sm:$0xff] %vm284_vm0, %v7881_v3 }
 0x4bf   : > { %6058 = vst.msk [vmem:[%s9886_s9 + $0x80] sm:$0xff] %vm284_vm0, %v7883_v41  ;;  %v7791_v16 = vpop.f32.mrb[54].mxu1 }
 0x4c0   : > { %v7885_v30 = vadd.f32 %v7884_v26, %v7791_v16  ;;  %v5925_v11 = vpop.f32.mrb[55].mxu1 }
 0x4c1   : > { %v7887_v57 = vadd.f32 %v7886_v48, %v5925_v11 }
 0x4c2   : > { %6061 = vst.msk [vmem:[%s9886_s9 + $0x98] sm:$0xff] %vm284_vm0, %v7885_v30 }
 0x4c3   : > { %6060 = vst.msk [vmem:[%s9886_s9 + $0x90] sm:$0xff] %vm284_vm0, %v7887_v57  ;;  %v7794_v63 = vpop.f32.mrb[56].mxu1 }
 0x4c4   : > { %v7889_v28 = vadd.f32 %v7888_v62, %v7794_v63  ;;  %v5935_v37 = vpop.f32.mrb[57].mxu1 }
 0x4c6   : > { %6062 = vst.msk [vmem:[%s9886_s9 + $0xa0] sm:$0xff] %vm284_vm0, %v7889_v28 }
 0x4c7   : > { %v7797_v49 = vpop.f32.mrb[58].mxu1 }
 0x4c8   : > { %v7891_v52 = vadd.f32 %v7890_v29, %v7797_v49  ;;  %v5944_v44 = vpop.f32.mrb[59].mxu1 }
 0x4c9   : > { %v7893_v54 = vadd.f32 %v7892_v46, %v5944_v44 }
 0x4ca   : > { %6064 = vst.msk [vmem:[%s9886_s9 + $0xb0] sm:$0xff] %vm284_vm0, %v7891_v52 }
 0x4cb   : > { %6063 = vst.msk [vmem:[%s9886_s9 + $0xa8] sm:$0xff] %vm284_vm0, %v7893_v54  ;;  %v7800_v15 = vpop.f32.mrb[60].mxu1 }
 0x4cc   : > { %v5954_v32 = vpop.f32.mrb[61].mxu1 }
 0x4cd   : > { %v7895_v45 = vadd.f32 %v7894_v0, %v5954_v32 }
 0x4cf   : > { %6065 = vst.msk [vmem:[%s9886_s9 + $0xb8] sm:$0xff] %vm284_vm0, %v7895_v45  ;;  %v7803_v58 = vpop.f32.mrb[62].mxu1 }
 0x4d0   : > { %v7897_v31 = vadd.f32 %v7896_v43, %v7803_v58  ;;  %v5963_v53 = vpop.f32.mrb[63].mxu1 }
 0x4d1   : > { %v7899_v40 = vadd.f32 %v7898_v35, %v5963_v53 }
 0x4d2   : > { %6067 = vst.msk [vmem:[%s9886_s9 + $0xc8] sm:$0xff] %vm284_vm0, %v7897_v31 }
 0x4d3   : > { %6066 = vst.msk [vmem:[%s9886_s9 + $0xc0] sm:$0xff] %vm284_vm0, %v7899_v40  ;;  %v7806_v9 = vpop.f32.mrb[64].mxu1 }
 0x4d4   : > { %v7901_v19 = vadd.f32 %v7900_v51, %v7806_v9  ;;  %v5973_v47 = vpop.f32.mrb[65].mxu1 }
 0x4d5   : > { %v7903_v2 = vadd.f32 %v7902_v6, %v5973_v47 }
 0x4d6   : > { %6069 = vst.msk [vmem:[%s9886_s9 + $0xd8] sm:$0xff] %vm284_vm0, %v7901_v19 }
 0x4d7   : > { %6068 = vst.msk [vmem:[%s9886_s9 + $0xd0] sm:$0xff] %vm284_vm0, %v7903_v2  ;;  %v7809_v4 = vpop.f32.mrb[66].mxu1 }
 0x4d8   : > { %v7905_v24 = vadd.f32 %v7904_v8, %v7809_v4  ;;  %v5983_v59 = vpop.f32.mrb[67].mxu1 }
 0x4da   : > { %6070 = vst.msk [vmem:[%s9886_s9 + $0xe0] sm:$0xff] %vm284_vm0, %v7905_v24 }
 0x4db   : > { %v7812_v12 = vpop.f32.mrb[68].mxu1 }
 0x4dc   : > { %v7907_v56 = vadd.f32 %v7906_v42, %v7812_v12  ;;  %v5992_v61 = vpop.f32.mrb[69].mxu1 }
 0x4dd   : > { %v7909_v10 = vadd.f32 %v7908_v22, %v5992_v61 }
 0x4de   : > { %6072 = vst.msk [vmem:[%s9886_s9 + $0xf0] sm:$0xff] %vm284_vm0, %v7907_v56 }
 0x4df   : > { %6071 = vst.msk [vmem:[%s9886_s9 + $0xe8] sm:$0xff] %vm284_vm0, %v7909_v10  ;;  %v7815_v14 = vpop.f32.mrb[70].mxu1 }
 0x4e0   : > { %v6002_v23 = vpop.f32.mrb[71].mxu1 }
 0x4e1   : > { %v7911_v33 = vadd.f32 %v7910_v36, %v6002_v23 }
 0x4e3   : > { %6073 = vst.msk [vmem:[%s9886_s9 + $0xf8] sm:$0xff] %vm284_vm0, %v7911_v33 }
 0x4e4 PF: > { %s15_s22 = sadd.s32 1, %s8291_s22   ;;  %s10189_s18 = smov %s8283_s20 }
 0x4e5   : > { %p12_p8 = scmp.ge.s32.totalorder %s15_s22, 10   ;;  %s10190_s19 = smov %s8287_s21 }
 0x4e6   : > { %s10191_s20 = smov %s10194_s23  ;;  %s10192_s21 = smov %s10198_s24 }
 0x4e7   :  { %14 = sbr.rel (!%p12_p8) target bundleno = 3 (0x3), region = 81 }

</bundles_post_ra>
